<compile_context>
chip_gen: v5e
topology: v5e:2x2
jax: 0.10.0
libtpu: 0.0.40
codegen_flags: <defaults>
</compile_context>

<pallas_src>
import functools

import jax
import jax.numpy as jnp
from jax.experimental import pallas as pl
from jax.experimental.pallas import tpu as pltpu


HIDDEN = 256        # hidden width per head (nn.Linear(input_dim, 256))
OUT_LANES = 128     # lane-dense output slab width (policy lanes + value lane + pad)
BATCH_BLOCK = 256   # rows per grid step for large batches


def _a2c_kernel(x_ref, w1_ref, b1_ref, w2_ref, b2_ref, out_ref, *, action_dim):
    # x_ref  : [TB, D]          bf16
    # w1_ref : [D, 2*HIDDEN]    bf16  (policy cols 0..255 | value cols 256..511)
    # b1_ref : [1, 2*HIDDEN]    f32
    # w2_ref : [2*HIDDEN, 128]  bf16  (cols 0..A-1: policy W2 on rows 0..255;
    #                                  col A: value W2 on rows 256..511; rest 0)
    # b2_ref : [1, 128]         f32   (policy bias lanes 0..A-1, value bias lane A)
    # out_ref: [TB, 128]        f32   (policy in lanes 0..A-1, value in lane A)

    # Fused first layer for both heads: one bf16 MXU matmul, f32 accumulation.
    h = jnp.dot(x_ref[...], w1_ref[...], preferred_element_type=jnp.float32)
    h = jnp.maximum(h + b1_ref[...], 0.0)                          # [TB, 512] f32

    # Fused second layer (policy logits + value in one bf16 MXU pass, f32 acc).
    z = jnp.dot(h.astype(jnp.bfloat16), w2_ref[...],
                preferred_element_type=jnp.float32) + b2_ref[...]  # [TB, 128]

    lane = jax.lax.broadcasted_iota(jnp.int32, z.shape, 1)
    logits = jnp.where(lane < action_dim, z, -1e30)    # mask value + pad lanes (f32)
    m = jnp.max(logits, axis=-1, keepdims=True)
    e = jnp.exp(logits - m)
    policy = e / jnp.sum(e, axis=-1, keepdims=True)    # exact normalization

    # Policy in lanes < A (exactly 0 elsewhere), raw value injected in lane A.
    out_ref[...] = jnp.where(lane == action_dim, z, policy)


def pack_params(params, output_dim):
    """Pack torch-style params into the fused / lane-dense kernel layout."""
    w1p, b1p, w2p, b2p, w1v, b1v, w2v, b2v = params
    assert output_dim + 1 <= OUT_LANES
    w1 = jnp.concatenate([w1p, w1v], axis=1).astype(jnp.bfloat16)       # [D, 512]
    b1 = jnp.concatenate([b1p, b1v], axis=1).astype(jnp.float32)        # [1, 512]
    w2 = jnp.zeros((2 * HIDDEN, OUT_LANES), jnp.float32)
    w2 = w2.at[:HIDDEN, :output_dim].set(w2p.astype(jnp.float32))       # policy cols
    w2 = w2.at[HIDDEN:, output_dim].set(w2v.astype(jnp.float32)[:, 0])  # value col
    w2 = w2.astype(jnp.bfloat16)                                        # [512, 128] bf16
    b2 = jnp.zeros((1, OUT_LANES), jnp.float32)
    b2 = b2.at[:, :output_dim].set(b2p.astype(jnp.float32))
    b2 = b2.at[:, output_dim].set(b2v.astype(jnp.float32)[0, 0])        # value bias
    return w1, b1, w2, b2


def a2c_forward(x, packed, output_dim, *, batch_block=BATCH_BLOCK):
    """x: [B, C, H, W] or [D] or [B, D]. Returns (policy [B, A], value [B, 1])."""
    # Mirrors `x.unsqueeze(0) if x.dim() == 1 else x` then Flatten (NCHW row-major).
    if x.ndim == 1:
        x = x[None, :]
    xf = x.reshape(x.shape[0], -1)
    B, D = xf.shape
    w1, b1, w2, b2 = packed
    A = output_dim
    H2 = 2 * HIDDEN

    # Pad batch to a multiple of 16 (bf16 sublane packing); large batches stream
    # through the grid in blocks of `batch_block` rows with resident weights.
    Bp = max(16, -(-B // 16) * 16)
    if Bp > batch_block:
        TB = batch_block
        Bp = -(-B // TB) * TB
    else:
        TB = Bp
    x_pad = jnp.zeros((Bp, D), jnp.bfloat16).at[:B].set(xf.astype(jnp.bfloat16))

    grid = (Bp // TB,)

    cost = pl.CostEstimate(
        flops=2 * Bp * D * H2 + 2 * Bp * H2 * OUT_LANES,
        transcendentals=Bp * OUT_LANES,
        bytes_accessed=(x_pad.size * 2 + w1.size * 2 + b1.size * 4
                        + w2.size * 2 + b2.size * 4 + Bp * OUT_LANES * 4),
    )

    slab = pl.pallas_call(
        functools.partial(_a2c_kernel, action_dim=A),
        out_shape=jax.ShapeDtypeStruct((Bp, OUT_LANES), jnp.float32),
        grid=grid,
        in_specs=[
            pl.BlockSpec((TB, D), lambda i: (i, 0)),            # streamed activations
            pl.BlockSpec((D, H2), lambda i: (0, 0)),            # resident W1
            pl.BlockSpec((1, H2), lambda i: (0, 0)),            # resident b1
            pl.BlockSpec((H2, OUT_LANES), lambda i: (0, 0)),    # resident W2 (fused)
            pl.BlockSpec((1, OUT_LANES), lambda i: (0, 0)),     # resident b2 (fused)
        ],
        out_specs=pl.BlockSpec((TB, OUT_LANES), lambda i: (i, 0)),
        compiler_params=pltpu.CompilerParams(
            dimension_semantics=("parallel",)),
        cost_estimate=cost,
    )(x_pad, w1, b1, w2, b2)

    policy = slab[:B, :A]
    value = slab[:B, A:A + 1]
    return policy, value


def init_params(key, input_dim, output_dim):
    """Deterministic synthetic parameters (not a checkpoint load).

    Weights stored as [in, out] (transposed vs. torch.nn.Linear's [out, in]),
    biases stored as [1, out].
    """
    ks = jax.random.split(key, 8)
    s1 = 1.0 / jnp.sqrt(jnp.float32(input_dim))
    s2 = 1.0 / jnp.sqrt(jnp.float32(HIDDEN))
    w1p = jax.random.uniform(ks[0], (input_dim, HIDDEN), jnp.float32, -s1, s1)
    b1p = jax.random.uniform(ks[1], (1, HIDDEN), jnp.float32, -s1, s1)
    w2p = jax.random.uniform(ks[2], (HIDDEN, output_dim), jnp.float32, -s2, s2)
    b2p = jax.random.uniform(ks[3], (1, output_dim), jnp.float32, -s2, s2)
    w1v = jax.random.uniform(ks[4], (input_dim, HIDDEN), jnp.float32, -s1, s1)
    b1v = jax.random.uniform(ks[5], (1, HIDDEN), jnp.float32, -s1, s1)
    w2v = jax.random.uniform(ks[6], (HIDDEN, 1), jnp.float32, -s2, s2)
    b2v = jax.random.uniform(ks[7], (1, 1), jnp.float32, -s2, s2)
    return (w1p, b1p, w2p, b2p, w1v, b1v, w2v, b2v)


def _reference(x, params):
    """Plain-JAX reference emulating the kernel's bf16 weight / activation storage."""
    if x.ndim == 1:
        x = x[None, :]
    xf = x.reshape(x.shape[0], -1).astype(jnp.float32)
    w1p, b1p, w2p, b2p, w1v, b1v, w2v, b2v = params
    bf = lambda a: a.astype(jnp.bfloat16).astype(jnp.float32)
    xb = bf(xf)
    hp = jnp.maximum(xb @ bf(w1p) + b1p, 0.0)
    hv = jnp.maximum(xb @ bf(w1v) + b1v, 0.0)
    logits = bf(hp) @ bf(w2p) + b2p
    policy = jax.nn.softmax(logits, axis=-1)
    value = bf(hv) @ bf(w2v) + b2v
    return policy, value


if __name__ == "__main__":
    key = jax.random.PRNGKey(0)
    kx, kp, kb = jax.random.split(key, 3)

    # input_shape = (4, 16, 16) -> input_dim = 1024 ; output_dim = 8 actions
    B, C, H, W = 2, 4, 16, 16
    output_dim = 8
    input_dim = C * H * W

    x = jax.random.normal(kx, (B, C, H, W), jnp.float32)
    params = init_params(kp, input_dim, output_dim)
    packed = pack_params(params, output_dim)

    policy, value = a2c_forward(x, packed, output_dim)
    policy = jax.block_until_ready(policy)
    value = jax.block_until_ready(value)

    # Correctness vs. plain-JAX reference (bf16 weights/activations in the kernel
    # -> relaxed tolerances).
    ref_policy, ref_value = _reference(x, params)
    assert policy.shape == (B, output_dim) and value.shape == (B, 1)
    assert jnp.allclose(policy, ref_policy, atol=2e-2, rtol=2e-2)
    assert jnp.allclose(value, ref_value, atol=2e-2, rtol=2e-2)
    assert jnp.allclose(jnp.sum(policy, axis=-1), 1.0, atol=1e-3)

    # Larger batch exercises the multi-block grid path (resident weights,
    # batch padding to the 256-row block) that amortizes the weight DMA.
    Bl = 300
    xl = jax.random.normal(kb, (Bl, C, H, W), jnp.float32)
    pol_l, val_l = a2c_forward(xl, packed, output_dim)
    pol_l = jax.block_until_ready(pol_l)
    val_l = jax.block_until_ready(val_l)
    ref_pol_l, ref_val_l = _reference(xl, params)
    assert pol_l.shape == (Bl, output_dim) and val_l.shape == (Bl, 1)
    assert jnp.allclose(pol_l, ref_pol_l, atol=2e-2, rtol=2e-2)
    assert jnp.allclose(val_l, ref_val_l, atol=2e-2, rtol=2e-2)
    assert jnp.allclose(jnp.sum(pol_l, axis=-1), 1.0, atol=1e-3)

    print("KERNEL_OK")
</pallas_src>

<mosaic_0001>
module attributes {stable_mosaic.version = 11 : i64} {
  func.func @_a2c_kernel(%arg0: i32, %arg1: memref<16x1024xbf16, #tpu.memory_space<vmem>>, %arg2: memref<1024x512xbf16, #tpu.memory_space<vmem>>, %arg3: memref<1x512xf32, #tpu.memory_space<vmem>>, %arg4: memref<512x128xbf16, #tpu.memory_space<vmem>>, %arg5: memref<1x128xf32, #tpu.memory_space<vmem>>, %arg6: memref<16x128xf32, #tpu.memory_space<vmem>>) attributes {dimension_semantics = [#tpu.dimension_semantics<parallel>], iteration_bounds = array<i64: 1>, scalar_prefetch = 0 : i64, scratch_operands = 0 : i64, tpu.core_type = #tpu.core_type<tc>, window_params = [{transform_indices = @transform_0, window_bounds = array<i64: 16, 1024>}, {pipeline_mode = #tpu.pipeline_mode<synchronous>, transform_indices = @transform_1, window_bounds = array<i64: 1024, 512>}, {pipeline_mode = #tpu.pipeline_mode<synchronous>, transform_indices = @transform_2, window_bounds = array<i64: 1, 512>}, {pipeline_mode = #tpu.pipeline_mode<synchronous>, transform_indices = @transform_3, window_bounds = array<i64: 512, 128>}, {pipeline_mode = #tpu.pipeline_mode<synchronous>, transform_indices = @transform_4, window_bounds = array<i64: 1, 128>}, {transform_indices = @transform_5, window_bounds = array<i64: 16, 128>}]} {
    %c0 = arith.constant 0 : index
    %c0_0 = arith.constant 0 : index
    %0 = vector.load %arg1[%c0, %c0_0] : memref<16x1024xbf16, #tpu.memory_space<vmem>>, vector<16x1024xbf16>
    %c0_1 = arith.constant 0 : index
    %c0_2 = arith.constant 0 : index
    %1 = vector.load %arg2[%c0_1, %c0_2] : memref<1024x512xbf16, #tpu.memory_space<vmem>>, vector<1024x512xbf16>
    %cst = arith.constant dense<0.000000e+00> : vector<16x512xf32>
    %2 = tpu.matmul %0, %1, %cst {dimension_numbers = #tpu.dot_dimension_numbers<[1], [0], [0], [1], [0, 0, 1, 1], [], []>} : vector<16x1024xbf16>, vector<1024x512xbf16>, vector<16x512xf32> -> vector<16x512xf32>
    %c0_3 = arith.constant 0 : index
    %c0_4 = arith.constant 0 : index
    %3 = vector.load %arg3[%c0_3, %c0_4] : memref<1x512xf32, #tpu.memory_space<vmem>>, vector<1x512xf32>
    %4 = vector.broadcast %3 : vector<1x512xf32> to vector<16x512xf32>
    %5 = arith.addf %2, %4 : vector<16x512xf32>
    %cst_5 = arith.constant 0.000000e+00 : f32
    %6 = vector.broadcast %cst_5 : f32 to vector<16x512xf32>
    %7 = arith.maximumf %5, %6 : vector<16x512xf32>
    %8 = arith.truncf %7 : vector<16x512xf32> to vector<16x512xbf16>
    %c0_6 = arith.constant 0 : index
    %c0_7 = arith.constant 0 : index
    %9 = vector.load %arg4[%c0_6, %c0_7] : memref<512x128xbf16, #tpu.memory_space<vmem>>, vector<512x128xbf16>
    %cst_8 = arith.constant dense<0.000000e+00> : vector<16x128xf32>
    %10 = tpu.matmul %8, %9, %cst_8 {dimension_numbers = #tpu.dot_dimension_numbers<[1], [0], [0], [1], [0, 0, 1, 1], [], []>} : vector<16x512xbf16>, vector<512x128xbf16>, vector<16x128xf32> -> vector<16x128xf32>
    %c0_9 = arith.constant 0 : index
    %c0_10 = arith.constant 0 : index
    %11 = vector.load %arg5[%c0_9, %c0_10] : memref<1x128xf32, #tpu.memory_space<vmem>>, vector<1x128xf32>
    %12 = vector.broadcast %11 : vector<1x128xf32> to vector<16x128xf32>
    %13 = arith.addf %10, %12 : vector<16x128xf32>
    %14 = tpu.iota {dimensions = array<i32: 1>} : vector<16x128xi32>
    %c8_i32 = arith.constant 8 : i32
    %15 = vector.broadcast %c8_i32 : i32 to vector<16x128xi32>
    %16 = arith.cmpi slt, %14, %15 : vector<16x128xi32>
    %cst_11 = arith.constant -1.000000e+30 : f32
    %17 = vector.broadcast %cst_11 : f32 to vector<16x128xf32>
    %18 = arith.select %16, %13, %17 : vector<16x128xi1>, vector<16x128xf32>
    %cst_12 = arith.constant dense<0xFF800000> : vector<16xf32>
    %19 = vector.multi_reduction <maximumf>, %18, %cst_12 [1] : vector<16x128xf32> to vector<16xf32>
    %20 = vector.shape_cast %19 : vector<16xf32> to vector<16x1xf32>
    %21 = vector.broadcast %20 : vector<16x1xf32> to vector<16x128xf32>
    %22 = arith.subf %18, %21 : vector<16x128xf32>
    %23 = math.exp %22 : vector<16x128xf32>
    %cst_13 = arith.constant dense<0.000000e+00> : vector<16xf32>
    %24 = vector.multi_reduction <add>, %23, %cst_13 [1] : vector<16x128xf32> to vector<16xf32>
    %25 = vector.shape_cast %24 : vector<16xf32> to vector<16x1xf32>
    %26 = vector.broadcast %25 : vector<16x1xf32> to vector<16x128xf32>
    %27 = arith.divf %23, %26 : vector<16x128xf32>
    %c8_i32_14 = arith.constant 8 : i32
    %28 = vector.broadcast %c8_i32_14 : i32 to vector<16x128xi32>
    %29 = arith.cmpi eq, %14, %28 : vector<16x128xi32>
    %30 = arith.select %29, %13, %27 : vector<16x128xi1>, vector<16x128xf32>
    %c0_15 = arith.constant 0 : index
    %c0_16 = arith.constant 0 : index
    %31 = vector.load %arg6[%c0_15, %c0_16] : memref<16x128xf32, #tpu.memory_space<vmem>>, vector<16x128xf32>
    tpu.vector_store %arg6[%c0_15, %c0_16], %30 {strides = array<i32>} : memref<16x128xf32, #tpu.memory_space<vmem>>, vector<16x128xf32>,
    return
  }
  func.func @transform_0(%arg0: i32) -> (i32, i32) {
    %c0_i32 = arith.constant 0 : i32
    %c0_i32_0 = arith.constant 0 : i32
    return %arg0, %c0_i32 : i32, i32
  }
  func.func @transform_1(%arg0: i32) -> (i32, i32) {
    %c0_i32 = arith.constant 0 : i32
    %c0_i32_0 = arith.constant 0 : i32
    %c0_i32_1 = arith.constant 0 : i32
    return %c0_i32, %c0_i32_0 : i32, i32
  }
  func.func @transform_2(%arg0: i32) -> (i32, i32) {
    %c0_i32 = arith.constant 0 : i32
    %c0_i32_0 = arith.constant 0 : i32
    %c0_i32_1 = arith.constant 0 : i32
    return %c0_i32, %c0_i32_0 : i32, i32
  }
  func.func @transform_3(%arg0: i32) -> (i32, i32) {
    %c0_i32 = arith.constant 0 : i32
    %c0_i32_0 = arith.constant 0 : i32
    %c0_i32_1 = arith.constant 0 : i32
    return %c0_i32, %c0_i32_0 : i32, i32
  }
  func.func @transform_4(%arg0: i32) -> (i32, i32) {
    %c0_i32 = arith.constant 0 : i32
    %c0_i32_0 = arith.constant 0 : i32
    %c0_i32_1 = arith.constant 0 : i32
    return %c0_i32, %c0_i32_0 : i32, i32
  }
  func.func @transform_5(%arg0: i32) -> (i32, i32) {
    %c0_i32 = arith.constant 0 : i32
    %c0_i32_0 = arith.constant 0 : i32
    return %arg0, %c0_i32 : i32, i32
  }
}

</mosaic_0001>

<bundles_post_ra>
// kernel: tpu_custom_call.1
= control target key start
LH: loop header
LB: loop body
LE: loop exit
PB: predicated region body
PF: predicated region fallthrough
CT: control target
= control target key end

     0   :  { %10 = vsyncpa [#allocation3], 0  ;;  %s4328_s0 = inlined_call_operand.hbm [shape: bf16[16,1024], index: 0, kind: input, shape index: {}]   ;;  %s4329_s1 = inlined_call_operand.hbm [shape: bf16[1024,512], index: 1, kind: input, shape index: {}]   ;;  %s4330_s2 = inlined_call_operand.hbm [shape: f32[1,512], index: 2, kind: input, shape index: {}]   ;;  %s4331_s3 = inlined_call_operand.hbm [shape: bf16[512,128], index: 3, kind: input, shape index: {}]   ;;  %s4332_s4 = inlined_call_operand.vmem [shape: f32[1,128], index: 4, kind: input, shape index: {}]   ;;  %s4333_s5 = inlined_call_operand.hbm [shape: f32[16,128], index: 5, kind: output, shape index: {}]  }
   0x1   :  { %11 = vsyncpa [#allocation6], 0 }
   0x2   :  { %12 = vsyncpa [#allocation9], 0  ;;  %s31_s20 = sshll.u32 %s4329_s1, 4  ;;  %s32_s20 = int_to_ptr.hbm [resolvable:$true] %s31_s20 }
   0x3   :  { %13 = vsyncpa [#allocation4], 0  ;;  %s4157_s21 = smov [#allocation5]   ;;  %s18_s25 = sshll.u32 %s4328_s0, 4  ;;  %s19_s25 = int_to_ptr.hbm [resolvable:$true] %s18_s25 }
   0x4   :  { %s33_s22 = sshll.u32 %s4157_s21, 4  ;;  %s4158_s26 = smov 256   ;;  %s34_s22 = int_to_ptr.vmem [resolvable:$true] %s33_s22 }
   0x5   :  { %s4159_s27 = smov 16   ;;  %s4160_s28 = smov [#allocation2]  }
   0x6   :  { %39 = dma.hbm_to_vmem [thread:$0]  %s32_s20, 32768, %s34_s22, [#allocation6], %s4158_s26, %s4158_s26, %s4159_s27  }
   0x7   :  { %s20_s29 = sshll.u32 %s4160_s28, 4  ;;  %s4161_s30 = smov 512   ;;  %s21_s29 = int_to_ptr.vmem [resolvable:$true] %s20_s29 }
   0x8   :  { %s4162_s6 = smov 32   ;;  %s45_s8 = sshll.u32 %s4330_s2, 4  ;;  %s46_s8 = int_to_ptr.hbm [resolvable:$true] %s45_s8 }
   0x9   :  { %26 = dma.hbm_to_vmem [thread:$0]  %s19_s25, 1024, %s21_s29, [#allocation3], %s4161_s30, %s4161_s30, %s4162_s6  }
   0xa   :  { %s4163_s9 = smov [#allocation7]   ;;  %s55_s12 = sshll.u32 %s4331_s3, 4  ;;  %s56_s12 = int_to_ptr.hbm [resolvable:$true] %s55_s12 }
   0xb   :  { %s47_s10 = sshll.u32 %s4163_s9, 4  ;;  %s4164_s13 = smov [#allocation8]   ;;  %s48_s10 = int_to_ptr.vmem [resolvable:$true] %s47_s10 }
   0xc   :  { %50 = dma.hbm_to_vmem [thread:$0]  %s46_s8, 64, %s48_s10, [#allocation6]  }
   0xd   :  { %s57_s14 = sshll.u32 %s4164_s13, 4  ;;  %s4165_s15 = smov 64   ;;  %s58_s14 = int_to_ptr.vmem [resolvable:$true] %s57_s14 }
   0xe   :  { %s4166_s16 = smov 4  }
   0xf   :  { %63 = dma.hbm_to_vmem [thread:$0]  %s56_s12, 4096, %s58_s14, [#allocation9], %s4165_s15, %s4165_s15, %s4166_s16  }
  0x10   :  { %4149 = dma.done.wait [#allocation3], 1024  }
  0x11   :  { %4150 = vsyncadd [#allocation3], 4294966272 }
  0x12   :  { %4151 = dma.done.wait [#allocation6], 32832  }
  0x13   :  { %4152 = vsyncadd [#allocation6], 4294934464 }
  0x14   :  { %4153 = dma.done.wait [#allocation9], 4096  }
  0x15   :  { %4154 = vsyncadd [#allocation9], 4294963200  ;;  %v2673_v0 = vld [vmem:[#allocation5 + $0xe0] sm:$0xf]  ;;  %v3749_v1 = vld [vmem:[#allocation5 + $0xec] sm:$0xf0] }
  0x16   :  { %v2801_v2 = vld [vmem:[#allocation5 + $0x1e0] sm:$0xf]  ;;  %v2674_v3 = vor.u32 %v3749_v1, %v2673_v0  ;;  %v3781_v4 = vld [vmem:[#allocation5 + $0x1ec] sm:$0xf0]  ;;  %s2512_s20 = sshll.u32 %s4333_s5, 4  ;;  %s4168_s21 = smov 128   ;;  %s2513_s20 = int_to_ptr.hbm [resolvable:$true] %s2512_s20 }
  0x17   :  { %v2929_v5 = vld [vmem:[#allocation5 + $0x2e0] sm:$0xf]  ;;  %v3813_v6 = vld [vmem:[#allocation5 + $0x2ec] sm:$0xf0]  ;;  %v2802_v7 = vor.u32 %v3781_v4, %v2801_v2  ;;  %s4169_s22 = smov 8  }
  0x18   :  { %v2930_v8 = vor.u32 %v3813_v6, %v2929_v5  ;;  %v3057_v9 = vld [vmem:[#allocation5 + $0x3e0] sm:$0xf]  ;;  %v3845_v10 = vld [vmem:[#allocation5 + $0x3ec] sm:$0xf0]  ;;  %1676 = vmatpush.bf16.msra.mxu0 %v2674_v3 }
  0x19   :  { %v2657_v11 = vld [vmem:[#allocation5 + $0xc0] sm:$0xf]  ;;  %v3058_v12 = vor.u32 %v3845_v10, %v3057_v9  ;;  %v3745_v13 = vld [vmem:[#allocation5 + $0xcc] sm:$0xf0]  ;;  %1690 = vmatpush.bf16.msra.mxu1 %v2802_v7 }
  0x1a   :  { %v2785_v14 = vld [vmem:[#allocation5 + $0x1c0] sm:$0xf]  ;;  %v3777_v15 = vld [vmem:[#allocation5 + $0x1cc] sm:$0xf0]  ;;  %1704 = vmatpush.bf16.msra.mxu2 %v2930_v8  ;;  %v2658_v16 = vor.u32 %v3745_v13, %v2657_v11 }
  0x1b   :  { %v2786_v17 = vor.u32 %v3777_v15, %v2785_v14  ;;  %v2913_v18 = vld [vmem:[#allocation5 + $0x2c0] sm:$0xf]  ;;  %v3809_v19 = vld [vmem:[#allocation5 + $0x2cc] sm:$0xf0]  ;;  %1718 = vmatpush.bf16.msra.mxu3 %v3058_v12 }
  0x1c   :  { %v3041_v20 = vld [vmem:[#allocation5 + $0x3c0] sm:$0xf]  ;;  %v2914_v21 = vor.u32 %v3809_v19, %v2913_v18  ;;  %v3841_v22 = vld [vmem:[#allocation5 + $0x3cc] sm:$0xf0]  ;;  %1677 = vmatpush.bf16.msra.mxu0 %v2658_v16 }
  0x1d   :  { %v2641_v23 = vld [vmem:[#allocation5 + $0xa0] sm:$0xf]  ;;  %v3741_v24 = vld [vmem:[#allocation5 + $0xac] sm:$0xf0]  ;;  %v3042_v25 = vor.u32 %v3841_v22, %v3041_v20  ;;  %1691 = vmatpush.bf16.msra.mxu1 %v2786_v17 }
  0x1e   :  { %v2769_v26 = vld [vmem:[#allocation5 + $0x1a0] sm:$0xf]  ;;  %v3773_v27 = vld [vmem:[#allocation5 + $0x1ac] sm:$0xf0]  ;;  %v2642_v29 = vor.u32 %v3741_v24, %v2641_v23  ;;  %1705 = vmatpush.bf16.msra.mxu2 %v2914_v21 }
  0x1f   :  { %v2897_v28 = vld [vmem:[#allocation5 + $0x2a0] sm:$0xf]  ;;  %v3805_v30 = vld [vmem:[#allocation5 + $0x2ac] sm:$0xf0]  ;;  %v2770_v33 = vor.u32 %v3773_v27, %v2769_v26  ;;  %1719 = vmatpush.bf16.msra.mxu3 %v3042_v25 }
  0x20   :  { %v3025_v31 = vld [vmem:[#allocation5 + $0x3a0] sm:$0xf]  ;;  %v3837_v32 = vld [vmem:[#allocation5 + $0x3ac] sm:$0xf0]  ;;  %v2898_v34 = vor.u32 %v3805_v30, %v2897_v28  ;;  %1678 = vmatpush.bf16.msra.mxu0 %v2642_v29 }
  0x21   :  { %v2625_v35 = vld [vmem:[#allocation5 + $0x80] sm:$0xf]  ;;  %v3737_v36 = vld [vmem:[#allocation5 + $0x8c] sm:$0xf0]  ;;  %v3026_v38 = vor.u32 %v3837_v32, %v3025_v31  ;;  %1692 = vmatpush.bf16.msra.mxu1 %v2770_v33 }
  0x22   :  { %v2753_v37 = vld [vmem:[#allocation5 + $0x180] sm:$0xf]  ;;  %v3769_v39 = vld [vmem:[#allocation5 + $0x18c] sm:$0xf0]  ;;  %v2626_v44 = vor.u32 %v3737_v36, %v2625_v35  ;;  %1706 = vmatpush.bf16.msra.mxu2 %v2898_v34 }
  0x23   :  { %v2881_v40 = vld [vmem:[#allocation5 + $0x280] sm:$0xf]  ;;  %v3801_v41 = vld [vmem:[#allocation5 + $0x28c] sm:$0xf0]  ;;  %v2754_v45 = vor.u32 %v3769_v39, %v2753_v37  ;;  %1720 = vmatpush.bf16.msra.mxu3 %v3026_v38 }
  0x24   :  { %v3009_v42 = vld [vmem:[#allocation5 + $0x380] sm:$0xf]  ;;  %v3833_v43 = vld [vmem:[#allocation5 + $0x38c] sm:$0xf0]  ;;  %v2882_v46 = vor.u32 %v3801_v41, %v2881_v40  ;;  %1679 = vmatpush.bf16.msra.mxu0 %v2626_v44 }
  0x25   :  { %v2609_v47 = vld [vmem:[#allocation5 + $0x60] sm:$0xf]  ;;  %v3733_v48 = vld [vmem:[#allocation5 + $0x6c] sm:$0xf0]  ;;  %v3010_v50 = vor.u32 %v3833_v43, %v3009_v42  ;;  %1693 = vmatpush.bf16.msra.mxu1 %v2754_v45 }
  0x26   :  { %v2737_v49 = vld [vmem:[#allocation5 + $0x160] sm:$0xf]  ;;  %v3765_v51 = vld [vmem:[#allocation5 + $0x16c] sm:$0xf0]  ;;  %v2610_v56 = vor.u32 %v3733_v48, %v2609_v47  ;;  %1707 = vmatpush.bf16.msra.mxu2 %v2882_v46 }
  0x27   :  { %v2865_v52 = vld [vmem:[#allocation5 + $0x260] sm:$0xf]  ;;  %v3797_v53 = vld [vmem:[#allocation5 + $0x26c] sm:$0xf0]  ;;  %v2738_v57 = vor.u32 %v3765_v51, %v2737_v49  ;;  %1721 = vmatpush.bf16.msra.mxu3 %v3010_v50 }
  0x28   :  { %v2993_v54 = vld [vmem:[#allocation5 + $0x360] sm:$0xf]  ;;  %v3829_v55 = vld [vmem:[#allocation5 + $0x36c] sm:$0xf0]  ;;  %v2866_v58 = vor.u32 %v3797_v53, %v2865_v52  ;;  %1680 = vmatpush.bf16.msra.mxu0 %v2610_v56 }
  0x29   :  { %v2593_v59 = vld [vmem:[#allocation5 + $0x40] sm:$0xf]  ;;  %v3729_v60 = vld [vmem:[#allocation5 + $0x4c] sm:$0xf0]  ;;  %v2994_v62 = vor.u32 %v3829_v55, %v2993_v54  ;;  %1694 = vmatpush.bf16.msra.mxu1 %v2738_v57  ;;  %v2537_v54 = vld [vmem:[#allocation2 + $0x8] sm:$0xf] }
  0x2a   :  { %v2721_v61 = vld [vmem:[#allocation5 + $0x140] sm:$0xf]  ;;  %v3761_v63 = vld [vmem:[#allocation5 + $0x14c] sm:$0xf0]  ;;  %v2594_v4 = vor.u32 %v3729_v60, %v2593_v59  ;;  %1708 = vmatpush.bf16.msra.mxu2 %v2866_v58  ;;  %v3716_v59 = vld [vmem:[#allocation2 + $0x24] sm:$0xf0] }
  0x2b   :  { %v2849_v0 = vld [vmem:[#allocation5 + $0x240] sm:$0xf]  ;;  %v3793_v1 = vld [vmem:[#allocation5 + $0x24c] sm:$0xf0]  ;;  %v2722_v5 = vor.u32 %v3761_v63, %v2721_v61  ;;  %1722 = vmatpush.bf16.msra.mxu3 %v2994_v62 }
  0x2c   :  { %v2977_v2 = vld [vmem:[#allocation5 + $0x340] sm:$0xf]  ;;  %v3825_v3 = vld [vmem:[#allocation5 + $0x34c] sm:$0xf0]  ;;  %v2850_v6 = vor.u32 %v3793_v1, %v2849_v0  ;;  %1681 = vmatpush.bf16.msra.mxu0 %v2594_v4  ;;  %v4214_v1 = vor.u32 %v3716_v59, %v2537_v54 }
  0x2d   :  { %v2577_v7 = vld [vmem:[#allocation5 + $0x20] sm:$0xf]  ;;  %v3725_v8 = vld [vmem:[#allocation5 + $0x2c] sm:$0xf0]  ;;  %v2978_v10 = vor.u32 %v3825_v3, %v2977_v2  ;;  %1695 = vmatpush.bf16.msra.mxu1 %v2722_v5 }
  0x2e   :  { %v2705_v9 = vld [vmem:[#allocation5 + $0x120] sm:$0xf]  ;;  %v3757_v11 = vld [vmem:[#allocation5 + $0x12c] sm:$0xf0]  ;;  %v2578_v16 = vor.u32 %v3725_v8, %v2577_v7  ;;  %1709 = vmatpush.bf16.msra.mxu2 %v2850_v6  ;;  %v3711_v6 = vld [vmem:[#allocation2 + $0x4] sm:$0xf] }
  0x2f   :  { %v2833_v12 = vld [vmem:[#allocation5 + $0x220] sm:$0xf]  ;;  %v3789_v13 = vld [vmem:[#allocation5 + $0x22c] sm:$0xf0]  ;;  %v2706_v19 = vor.u32 %v3757_v11, %v2705_v9  ;;  %1723 = vmatpush.bf16.msra.mxu3 %v2978_v10  ;;  %v2531_v7 = vld [vmem:[#allocation2 + $0x20] sm:$0xf0] }
  0x30   :  { %v2961_v14 = vld [vmem:[#allocation5 + $0x320] sm:$0xf]  ;;  %v3821_v15 = vld [vmem:[#allocation5 + $0x32c] sm:$0xf0]  ;;  %v2834_v20 = vor.u32 %v3789_v13, %v2833_v12  ;;  %1682 = vmatpush.bf16.msra.mxu0 %v2578_v16  ;;  %v3712_v8 = vld [vmem:[#allocation2 + $0xc] sm:$0xf]  ;;  %v4218_v10 = vor.u32 %v3711_v6, %v2531_v7 }
  0x31   :  { %v2561_v17 = vld [vmem:[#allocation5] sm:$0xf]  ;;  %v3721_v18 = vld [vmem:[#allocation5 + $0xc] sm:$0xf0]  ;;  %v2962_v24 = vor.u32 %v3821_v15, %v2961_v14  ;;  %1696 = vmatpush.bf16.msra.mxu1 %v2706_v19  ;;  %v2539_v11 = vld [vmem:[#allocation2 + $0x28] sm:$0xf0] }
  0x32   :  { %v2689_v21 = vld [vmem:[#allocation5 + $0x100] sm:$0xf]  ;;  %v3753_v22 = vld [vmem:[#allocation5 + $0x10c] sm:$0xf0]  ;;  %v2562_v31 = vor.u32 %v3721_v18, %v2561_v17  ;;  %1710 = vmatpush.bf16.msra.mxu2 %v2834_v20  ;;  %v4220_v17 = vor.u32 %v3712_v8, %v2539_v11 }
  0x33   :  { %v2817_v23 = vld [vmem:[#allocation5 + $0x200] sm:$0xf]  ;;  %v3785_v25 = vld [vmem:[#allocation5 + $0x20c] sm:$0xf0]  ;;  %v2690_v35 = vor.u32 %v3753_v22, %v2689_v21  ;;  %1724 = vmatpush.bf16.msra.mxu3 %v2962_v24 }
  0x34   :  { %v2945_v26 = vld [vmem:[#allocation5 + $0x300] sm:$0xf]  ;;  %v3817_v27 = vld [vmem:[#allocation5 + $0x30c] sm:$0xf0]  ;;  %v2818_v36 = vor.u32 %v3785_v25, %v2817_v23  ;;  %1683 = vmatpush.bf16.msra.mxu0 %v2562_v31 }
  0x35   :  { %v3185_v28 = vld [vmem:[#allocation5 + $0x4e0] sm:$0xf]  ;;  %v3877_v29 = vld [vmem:[#allocation5 + $0x4ec] sm:$0xf0]  ;;  %v2946_v39 = vor.u32 %v3817_v27, %v2945_v26  ;;  %1697 = vmatpush.bf16.msra.mxu1 %v2690_v35 }
  0x36   :  { %v3313_v30 = vld [vmem:[#allocation5 + $0x5e0] sm:$0xf]  ;;  %v3909_v32 = vld [vmem:[#allocation5 + $0x5ec] sm:$0xf0]  ;;  %v3186_v40 = vor.u32 %v3877_v29, %v3185_v28  ;;  %1711 = vmatpush.bf16.msra.mxu2 %v2818_v36 }
  0x37   :  { %v3441_v33 = vld [vmem:[#allocation5 + $0x6e0] sm:$0xf]  ;;  %v3941_v34 = vld [vmem:[#allocation5 + $0x6ec] sm:$0xf0]  ;;  %v3314_v43 = vor.u32 %v3909_v32, %v3313_v30  ;;  %1725 = vmatpush.bf16.msra.mxu3 %v2946_v39 }
  0x38   :  { %v3569_v37 = vld [vmem:[#allocation5 + $0x7e0] sm:$0xf]  ;;  %v3973_v38 = vld [vmem:[#allocation5 + $0x7ec] sm:$0xf0]  ;;  %v3442_v44 = vor.u32 %v3941_v34, %v3441_v33  ;;  %1732 = vmatpush.bf16.msrb.mxu0 %v3186_v40  ;;  %1698 = vmatmul.bf16.vlgmr.msra.gmra.mxu1 %v4218_v10 }
  0x39   :  { %v3169_v41 = vld [vmem:[#allocation5 + $0x4c0] sm:$0xf]  ;;  %v3873_v42 = vld [vmem:[#allocation5 + $0x4cc] sm:$0xf0]  ;;  %v3570_v48 = vor.u32 %v3973_v38, %v3569_v37  ;;  %1746 = vmatpush.bf16.msrb.mxu1 %v3314_v43  ;;  %1712 = vmatmul.bf16.vlgmr.msra.gmra.mxu2 %v4214_v1 }
  0x3a   :  { %v3297_v45 = vld [vmem:[#allocation5 + $0x5c0] sm:$0xf]  ;;  %v3905_v46 = vld [vmem:[#allocation5 + $0x5cc] sm:$0xf0]  ;;  %v3170_v55 = vor.u32 %v3873_v42, %v3169_v41  ;;  %1760 = vmatpush.bf16.msrb.mxu2 %v3442_v44  ;;  %1726 = vmatmul.bf16.vlgmr.msra.gmra.mxu3 %v4220_v17 }
  0x3b   :  { %v3425_v47 = vld [vmem:[#allocation5 + $0x6c0] sm:$0xf]  ;;  %v3937_v49 = vld [vmem:[#allocation5 + $0x6cc] sm:$0xf0]  ;;  %v3298_v60 = vor.u32 %v3905_v46, %v3297_v45  ;;  %1774 = vmatpush.bf16.msrb.mxu3 %v3570_v48 }
  0x3c   :  { %v3553_v50 = vld [vmem:[#allocation5 + $0x7c0] sm:$0xf]  ;;  %v3969_v51 = vld [vmem:[#allocation5 + $0x7cc] sm:$0xf0]  ;;  %v3426_v61 = vor.u32 %v3937_v49, %v3425_v47  ;;  %1733 = vmatpush.bf16.msrb.mxu0 %v3170_v55 }
  0x3d   :  { %v2529_v52 = vld [vmem:[#allocation2] sm:$0xf]  ;;  %v3869_v57 = vld [vmem:[#allocation5 + $0x4ac] sm:$0xf0]  ;;  %v3554_v2 = vor.u32 %v3969_v51, %v3553_v50  ;;  %1747 = vmatpush.bf16.msrb.mxu1 %v3298_v60 }
  0x3e   :  { %v3715_v53 = vld [vmem:[#allocation2 + $0x1c] sm:$0xf0]  ;;  %v3901_v63 = vld [vmem:[#allocation5 + $0x5ac] sm:$0xf0]  ;;  %1761 = vmatpush.bf16.msrb.mxu2 %v3426_v61 }
  0x3f   :  { %v3153_v56 = vld [vmem:[#allocation5 + $0x4a0] sm:$0xf]  ;;  %v4212_v58 = vor.u32 %v3715_v53, %v2529_v52  ;;  %v3933_v3 = vld [vmem:[#allocation5 + $0x6ac] sm:$0xf0]  ;;  %1775 = vmatpush.bf16.msrb.mxu3 %v3554_v2 }
  0x40   :  { %v3281_v62 = vld [vmem:[#allocation5 + $0x5a0] sm:$0xf]  ;;  %v3965_v5 = vld [vmem:[#allocation5 + $0x7ac] sm:$0xf0]  ;;  %v3154_v9 = vor.u32 %v3869_v57, %v3153_v56 }
  0x41   :  { %v3409_v0 = vld [vmem:[#allocation5 + $0x6a0] sm:$0xf]  ;;  %1684 = vmatmul.bf16.vlgmr.msra.gmra.mxu0 %v4212_v58  ;;  %v3282_v12 = vor.u32 %v3901_v63, %v3281_v62  ;;  %v3865_v15 = vld [vmem:[#allocation5 + $0x48c] sm:$0xf0] }
  0x42   :  { %v3537_v4 = vld [vmem:[#allocation5 + $0x7a0] sm:$0xf]  ;;  %v3410_v13 = vor.u32 %v3933_v3, %v3409_v0  ;;  %v3897_v19 = vld [vmem:[#allocation5 + $0x58c] sm:$0xf0]  ;;  %1734 = vmatpush.bf16.msrb.mxu0 %v3154_v9  ;;  %v3747_v9 = vld [vmem:[#allocation5 + $0xe4] sm:$0xf] }
  0x43   :  { %v3137_v14 = vld [vmem:[#allocation5 + $0x480] sm:$0xf]  ;;  %v3538_v18 = vor.u32 %v3965_v5, %v3537_v4  ;;  %v3929_v21 = vld [vmem:[#allocation5 + $0x68c] sm:$0xf0]  ;;  %1748 = vmatpush.bf16.msrb.mxu1 %v3282_v12  ;;  %v2675_v12 = vld [vmem:[#allocation5 + $0xf0] sm:$0xf0] }
  0x44   :  { %v3265_v16 = vld [vmem:[#allocation5 + $0x580] sm:$0xf]  ;;  %v3961_v23 = vld [vmem:[#allocation5 + $0x78c] sm:$0xf0]  ;;  %v3138_v24 = vor.u32 %v3865_v15, %v3137_v14  ;;  %1762 = vmatpush.bf16.msrb.mxu2 %v3410_v13  ;;  %v3779_v13 = vld [vmem:[#allocation5 + $0x1e4] sm:$0xf] }
  0x45   :  { %v3393_v20 = vld [vmem:[#allocation5 + $0x680] sm:$0xf]  ;;  %v3266_v25 = vor.u32 %v3897_v19, %v3265_v16  ;;  %v3861_v28 = vld [vmem:[#allocation5 + $0x46c] sm:$0xf0]  ;;  %1776 = vmatpush.bf16.msrb.mxu3 %v3538_v18  ;;  %v2803_v14 = vld [vmem:[#allocation5 + $0x1f0] sm:$0xf0] }
  0x46   :  { %v3521_v22 = vld [vmem:[#allocation5 + $0x780] sm:$0xf]  ;;  %v3394_v26 = vor.u32 %v3929_v21, %v3393_v20  ;;  %v3893_v31 = vld [vmem:[#allocation5 + $0x56c] sm:$0xf0]  ;;  %1735 = vmatpush.bf16.msrb.mxu0 %v3138_v24  ;;  %v3811_v15 = vld [vmem:[#allocation5 + $0x2e4] sm:$0xf] }
  0x47   :  { %v3121_v27 = vld [vmem:[#allocation5 + $0x460] sm:$0xf]  ;;  %v3522_v30 = vor.u32 %v3961_v23, %v3521_v22  ;;  %v3925_v33 = vld [vmem:[#allocation5 + $0x66c] sm:$0xf0]  ;;  %1749 = vmatpush.bf16.msrb.mxu1 %v3266_v25  ;;  %v2931_v16 = vld [vmem:[#allocation5 + $0x2f0] sm:$0xf0] }
  0x48   :  { %v3249_v29 = vld [vmem:[#allocation5 + $0x560] sm:$0xf]  ;;  %v3957_v35 = vld [vmem:[#allocation5 + $0x76c] sm:$0xf0]  ;;  %v3122_v36 = vor.u32 %v3861_v28, %v3121_v27  ;;  %1763 = vmatpush.bf16.msrb.mxu2 %v3394_v26  ;;  %v3843_v18 = vld [vmem:[#allocation5 + $0x3e4] sm:$0xf] }
  0x49   :  { %v3377_v32 = vld [vmem:[#allocation5 + $0x660] sm:$0xf]  ;;  %v3250_v37 = vor.u32 %v3893_v31, %v3249_v29  ;;  %v3857_v40 = vld [vmem:[#allocation5 + $0x44c] sm:$0xf0]  ;;  %1777 = vmatpush.bf16.msrb.mxu3 %v3522_v30  ;;  %v3059_v20 = vld [vmem:[#allocation5 + $0x3f0] sm:$0xf0]  ;;  %v2678_v29 = vor.u32 %v3747_v9, %v2675_v12 }
  0x4a   :  { %v3505_v34 = vld [vmem:[#allocation5 + $0x760] sm:$0xf]  ;;  %v3378_v38 = vor.u32 %v3925_v33, %v3377_v32  ;;  %v3889_v43 = vld [vmem:[#allocation5 + $0x54c] sm:$0xf0]  ;;  %1736 = vmatpush.bf16.msrb.mxu0 %v3122_v36  ;;  %v2553_v25 = vld [vmem:[#allocation2 + $0x18] sm:$0xf]  ;;  %v2806_v33 = vor.u32 %v3779_v13, %v2803_v14 }
  0x4b   :  { %v3105_v39 = vld [vmem:[#allocation5 + $0x440] sm:$0xf]  ;;  %v3506_v42 = vor.u32 %v3957_v35, %v3505_v34  ;;  %v3921_v45 = vld [vmem:[#allocation5 + $0x64c] sm:$0xf0]  ;;  %1750 = vmatpush.bf16.msrb.mxu1 %v3250_v37  ;;  %v3718_v26 = vld [vmem:[#allocation2 + $0x34] sm:$0xf0]  ;;  %v2934_v34 = vor.u32 %v3811_v15, %v2931_v16 }
  0x4c   :  { %v3233_v41 = vld [vmem:[#allocation5 + $0x540] sm:$0xf]  ;;  %v3953_v47 = vld [vmem:[#allocation5 + $0x74c] sm:$0xf0]  ;;  %v3106_v48 = vor.u32 %v3857_v40, %v3105_v39  ;;  %1764 = vmatpush.bf16.msrb.mxu2 %v3378_v38  ;;  %v3713_v27 = vld [vmem:[#allocation2 + $0x14] sm:$0xf]  ;;  %v3062_v38 = vor.u32 %v3843_v18, %v3059_v20 }
  0x4d   :  { %v3361_v44 = vld [vmem:[#allocation5 + $0x640] sm:$0xf]  ;;  %v3234_v50 = vor.u32 %v3889_v43, %v3233_v41  ;;  %v3853_v52 = vld [vmem:[#allocation5 + $0x42c] sm:$0xf0]  ;;  %1778 = vmatpush.bf16.msrb.mxu3 %v3506_v42  ;;  %v2547_v30 = vld [vmem:[#allocation2 + $0x30] sm:$0xf0]  ;;  %v4226_v43 = vor.u32 %v3718_v26, %v2553_v25 }
  0x4e   :  { %v3489_v46 = vld [vmem:[#allocation5 + $0x740] sm:$0xf]  ;;  %v3362_v51 = vor.u32 %v3921_v45, %v3361_v44  ;;  %v3885_v54 = vld [vmem:[#allocation5 + $0x52c] sm:$0xf0]  ;;  %1737 = vmatpush.bf16.msrb.mxu0 %v3106_v48  ;;  %v3714_v31 = vld [vmem:[#allocation2 + $0x1c] sm:$0xf]  ;;  %v4228_v44 = vor.u32 %v3713_v27, %v2547_v30 }
  0x4f   :  { %v3089_v49 = vld [vmem:[#allocation5 + $0x420] sm:$0xf]  ;;  %v3490_v55 = vor.u32 %v3953_v47, %v3489_v46  ;;  %v3917_v57 = vld [vmem:[#allocation5 + $0x62c] sm:$0xf0]  ;;  %1751 = vmatpush.bf16.msrb.mxu1 %v3234_v50  ;;  %v2555_v32 = vld [vmem:[#allocation2 + $0x38] sm:$0xf0] }
  0x50   :  { %v3217_v53 = vld [vmem:[#allocation5 + $0x520] sm:$0xf]  ;;  %v3949_v60 = vld [vmem:[#allocation5 + $0x72c] sm:$0xf0]  ;;  %v3090_v63 = vor.u32 %v3853_v52, %v3089_v49  ;;  %1765 = vmatpush.bf16.msrb.mxu2 %v3362_v51  ;;  %v3743_v35 = vld [vmem:[#allocation5 + $0xc4] sm:$0xf]  ;;  %v4230_v47 = vor.u32 %v3714_v31, %v2555_v32 }
  0x51   :  { %v3345_v56 = vld [vmem:[#allocation5 + $0x620] sm:$0xf]  ;;  %v3849_v62 = vld [vmem:[#allocation5 + $0x40c] sm:$0xf0]  ;;  %v3218_v5 = vor.u32 %v3885_v54, %v3217_v53  ;;  %1779 = vmatpush.bf16.msrb.mxu3 %v3490_v55  ;;  %v2659_v36 = vld [vmem:[#allocation5 + $0xd0] sm:$0xf0] }
  0x52   :  { %v3473_v59 = vld [vmem:[#allocation5 + $0x720] sm:$0xf]  ;;  %v3881_v2 = vld [vmem:[#allocation5 + $0x50c] sm:$0xf0]  ;;  %v3346_v6 = vor.u32 %v3917_v57, %v3345_v56  ;;  %1738 = vmatpush.bf16.msrb.mxu0 %v3090_v63  ;;  %v3775_v37 = vld [vmem:[#allocation5 + $0x1c4] sm:$0xf]  ;;  %v2662_v48 = vor.u32 %v3743_v35, %v2659_v36 }
  0x53   :  { %v3073_v61 = vld [vmem:[#allocation5 + $0x400] sm:$0xf]  ;;  %v3913_v4 = vld [vmem:[#allocation5 + $0x60c] sm:$0xf0]  ;;  %v3474_v11 = vor.u32 %v3949_v60, %v3473_v59  ;;  %1752 = vmatpush.bf16.msrb.mxu1 %v3218_v5  ;;  %v2787_v40 = vld [vmem:[#allocation5 + $0x1d0] sm:$0xf0] }
  0x54   :  { %v3201_v0 = vld [vmem:[#allocation5 + $0x500] sm:$0xf]  ;;  %v3945_v8 = vld [vmem:[#allocation5 + $0x70c] sm:$0xf0]  ;;  %v3074_v19 = vor.u32 %v3849_v62, %v3073_v61  ;;  %1766 = vmatpush.bf16.msrb.mxu2 %v3346_v6  ;;  %v3807_v41 = vld [vmem:[#allocation5 + $0x2c4] sm:$0xf]  ;;  %v2790_v49 = vor.u32 %v3775_v37, %v2787_v40 }
  0x55   :  { %v3329_v3 = vld [vmem:[#allocation5 + $0x600] sm:$0xf]  ;;  %v2545_v21 = vld [vmem:[#allocation2 + $0x10] sm:$0xf]  ;;  %v3202_v23 = vor.u32 %v3881_v2, %v3201_v0  ;;  %1780 = vmatpush.bf16.msrb.mxu3 %v3474_v11  ;;  %v2915_v42 = vld [vmem:[#allocation5 + $0x2d0] sm:$0xf0] }
  0x56   :  { %v3457_v7 = vld [vmem:[#allocation5 + $0x700] sm:$0xf]  ;;  %v3717_v22 = vld [vmem:[#allocation2 + $0x2c] sm:$0xf0]  ;;  %v3330_v24 = vor.u32 %v3913_v4, %v3329_v3  ;;  %1739 = vmatpush.bf16.msrb.mxu0 %v3074_v19  ;;  %v3839_v45 = vld [vmem:[#allocation5 + $0x3c4] sm:$0xf]  ;;  %v2918_v50 = vor.u32 %v3807_v41, %v2915_v42 }
  0x57   :  { %v3458_v28 = vor.u32 %v3945_v8, %v3457_v7  ;;  %v4224_v39 = vor.u32 %v3717_v22, %v2545_v21  ;;  %1753 = vmatpush.bf16.msrb.mxu1 %v3202_v23  ;;  %v3043_v46 = vld [vmem:[#allocation5 + $0x3d0] sm:$0xf0]  ;;  %v3739_v51 = vld [vmem:[#allocation5 + $0xa4] sm:$0xf] }
  0x58   :  { %1767 = vmatpush.bf16.msrb.mxu2 %v3330_v24  ;;  %v2643_v52 = vld [vmem:[#allocation5 + $0xb0] sm:$0xf0]  ;;  %v3771_v53 = vld [vmem:[#allocation5 + $0x1a4] sm:$0xf]  ;;  %v3046_v54 = vor.u32 %v3839_v45, %v3043_v46 }
  0x59   :  { %1781 = vmatpush.bf16.msrb.mxu3 %v3458_v28  ;;  %1740 = vmatmul.bf16.vlgmr.msrb.gmra.mxu0 %v4224_v39  ;;  %v2771_v55 = vld [vmem:[#allocation5 + $0x1b0] sm:$0xf0]  ;;  %v3803_v56 = vld [vmem:[#allocation5 + $0x2a4] sm:$0xf]  ;;  %v2646_v61 = vor.u32 %v3739_v51, %v2643_v52 }
  0x5a   :  { %1788 = vmatpush.bf16.msra.mxu0 %v2678_v29  ;;  %v2899_v57 = vld [vmem:[#allocation5 + $0x2b0] sm:$0xf0]  ;;  %1754 = vmatmul.bf16.vlgmr.msrb.gmra.mxu1 %v4228_v44  ;;  %v3835_v59 = vld [vmem:[#allocation5 + $0x3a4] sm:$0xf]  ;;  %v2774_v62 = vor.u32 %v3771_v53, %v2771_v55 }
  0x5b   :  { %1802 = vmatpush.bf16.msra.mxu1 %v2806_v33  ;;  %1768 = vmatmul.bf16.vlgmr.msrb.gmra.mxu2 %v4226_v43  ;;  %v3027_v60 = vld [vmem:[#allocation5 + $0x3b0] sm:$0xf0]  ;;  %v2902_v63 = vor.u32 %v3803_v56, %v2899_v57  ;;  %v3735_v0 = vld [vmem:[#allocation5 + $0x84] sm:$0xf] }
  0x5c   :  { %1816 = vmatpush.bf16.msra.mxu2 %v2934_v34  ;;  %1782 = vmatmul.bf16.vlgmr.msrb.gmra.mxu3 %v4230_v47  ;;  %v2627_v2 = vld [vmem:[#allocation5 + $0x90] sm:$0xf0]  ;;  %v3767_v3 = vld [vmem:[#allocation5 + $0x184] sm:$0xf]  ;;  %v3030_v4 = vor.u32 %v3835_v59, %v3027_v60 }
  0x5d   :  { %1830 = vmatpush.bf16.msra.mxu3 %v3062_v38  ;;  %v2755_v5 = vld [vmem:[#allocation5 + $0x190] sm:$0xf0]  ;;  %v3799_v6 = vld [vmem:[#allocation5 + $0x284] sm:$0xf]  ;;  %v2630_v11 = vor.u32 %v3735_v0, %v2627_v2 }
  0x5e   :  { %1789 = vmatpush.bf16.msra.mxu0 %v2662_v48  ;;  %v2883_v7 = vld [vmem:[#allocation5 + $0x290] sm:$0xf0]  ;;  %v3831_v8 = vld [vmem:[#allocation5 + $0x384] sm:$0xf]  ;;  %v2758_v12 = vor.u32 %v3767_v3, %v2755_v5 }
  0x5f   :  { %1803 = vmatpush.bf16.msra.mxu1 %v2790_v49  ;;  %v3011_v9 = vld [vmem:[#allocation5 + $0x390] sm:$0xf0]  ;;  %v2886_v13 = vor.u32 %v3799_v6, %v2883_v7  ;;  %v3731_v14 = vld [vmem:[#allocation5 + $0x64] sm:$0xf] }
  0x60   :  { %1817 = vmatpush.bf16.msra.mxu2 %v2918_v50  ;;  %v2611_v15 = vld [vmem:[#allocation5 + $0x70] sm:$0xf0]  ;;  %v3763_v16 = vld [vmem:[#allocation5 + $0x164] sm:$0xf]  ;;  %v3014_v18 = vor.u32 %v3831_v8, %v3011_v9 }
  0x61   :  { %1831 = vmatpush.bf16.msra.mxu3 %v3046_v54  ;;  %v2739_v19 = vld [vmem:[#allocation5 + $0x170] sm:$0xf0]  ;;  %v3795_v20 = vld [vmem:[#allocation5 + $0x264] sm:$0xf]  ;;  %v2614_v24 = vor.u32 %v3731_v14, %v2611_v15 }
  0x62   :  { %1790 = vmatpush.bf16.msra.mxu0 %v2646_v61  ;;  %v2867_v21 = vld [vmem:[#allocation5 + $0x270] sm:$0xf0]  ;;  %v3827_v22 = vld [vmem:[#allocation5 + $0x364] sm:$0xf]  ;;  %v2742_v25 = vor.u32 %v3763_v16, %v2739_v19 }
  0x63   :  { %1804 = vmatpush.bf16.msra.mxu1 %v2774_v62  ;;  %v2995_v23 = vld [vmem:[#allocation5 + $0x370] sm:$0xf0]  ;;  %v2870_v26 = vor.u32 %v3795_v20, %v2867_v21  ;;  %v3727_v27 = vld [vmem:[#allocation5 + $0x44] sm:$0xf] }
  0x64   :  { %1818 = vmatpush.bf16.msra.mxu2 %v2902_v63  ;;  %v2595_v28 = vld [vmem:[#allocation5 + $0x50] sm:$0xf0]  ;;  %v3759_v29 = vld [vmem:[#allocation5 + $0x144] sm:$0xf]  ;;  %v2998_v30 = vor.u32 %v3827_v22, %v2995_v23 }
  0x65   :  { %1832 = vmatpush.bf16.msra.mxu3 %v3030_v4  ;;  %v2723_v31 = vld [vmem:[#allocation5 + $0x150] sm:$0xf0]  ;;  %v3791_v32 = vld [vmem:[#allocation5 + $0x244] sm:$0xf]  ;;  %v2598_v36 = vor.u32 %v3727_v27, %v2595_v28 }
  0x66   :  { %1791 = vmatpush.bf16.msra.mxu0 %v2630_v11  ;;  %v2851_v33 = vld [vmem:[#allocation5 + $0x250] sm:$0xf0]  ;;  %v3823_v34 = vld [vmem:[#allocation5 + $0x344] sm:$0xf]  ;;  %v2726_v37 = vor.u32 %v3759_v29, %v2723_v31 }
  0x67   :  { %1805 = vmatpush.bf16.msra.mxu1 %v2758_v12  ;;  %v2979_v35 = vld [vmem:[#allocation5 + $0x350] sm:$0xf0]  ;;  %v2854_v38 = vor.u32 %v3791_v32, %v2851_v33  ;;  %v3723_v40 = vld [vmem:[#allocation5 + $0x24] sm:$0xf] }
  0x68   :  { %1819 = vmatpush.bf16.msra.mxu2 %v2886_v13  ;;  %v2579_v41 = vld [vmem:[#allocation5 + $0x30] sm:$0xf0]  ;;  %v3755_v42 = vld [vmem:[#allocation5 + $0x124] sm:$0xf]  ;;  %v2982_v45 = vor.u32 %v3823_v34, %v2979_v35 }
  0x69   :  { %1833 = vmatpush.bf16.msra.mxu3 %v3014_v18  ;;  %v2707_v46 = vld [vmem:[#allocation5 + $0x130] sm:$0xf0]  ;;  %v3787_v48 = vld [vmem:[#allocation5 + $0x224] sm:$0xf]  ;;  %v2582_v52 = vor.u32 %v3723_v40, %v2579_v41 }
  0x6a   :  { %1792 = vmatpush.bf16.msra.mxu0 %v2614_v24  ;;  %v2835_v49 = vld [vmem:[#allocation5 + $0x230] sm:$0xf0]  ;;  %v3819_v50 = vld [vmem:[#allocation5 + $0x324] sm:$0xf]  ;;  %v2710_v55 = vor.u32 %v3755_v42, %v2707_v46 }
  0x6b   :  { %1806 = vmatpush.bf16.msra.mxu1 %v2742_v25  ;;  %v2963_v51 = vld [vmem:[#allocation5 + $0x330] sm:$0xf0]  ;;  %v3719_v53 = vld [vmem:[#allocation5 + $0x4] sm:$0xf]  ;;  %v2838_v56 = vor.u32 %v3787_v48, %v2835_v49 }
  0x6c   :  { %1820 = vmatpush.bf16.msra.mxu2 %v2870_v26  ;;  %v2563_v54 = vld [vmem:[#allocation5 + $0x10] sm:$0xf0]  ;;  %v3751_v57 = vld [vmem:[#allocation5 + $0x104] sm:$0xf]  ;;  %v2966_v61 = vor.u32 %v3819_v50, %v2963_v51 }
  0x6d   :  { %1834 = vmatpush.bf16.msra.mxu3 %v2998_v30  ;;  %v2691_v59 = vld [vmem:[#allocation5 + $0x110] sm:$0xf0]  ;;  %v3783_v60 = vld [vmem:[#allocation5 + $0x204] sm:$0xf]  ;;  %v2566_v5 = vor.u32 %v3719_v53, %v2563_v54 }
  0x6e   :  { %1793 = vmatpush.bf16.msra.mxu0 %v2598_v36  ;;  %v2819_v62 = vld [vmem:[#allocation5 + $0x210] sm:$0xf0]  ;;  %v3815_v63 = vld [vmem:[#allocation5 + $0x304] sm:$0xf]  ;;  %v2694_v9 = vor.u32 %v3751_v57, %v2691_v59 }
  0x6f   :  { %1807 = vmatpush.bf16.msra.mxu1 %v2726_v37  ;;  %v2947_v0 = vld [vmem:[#allocation5 + $0x310] sm:$0xf0]  ;;  %v3875_v2 = vld [vmem:[#allocation5 + $0x4e4] sm:$0xf]  ;;  %v2822_v11 = vor.u32 %v3783_v60, %v2819_v62 }
  0x70   :  { %1821 = vmatpush.bf16.msra.mxu2 %v2854_v38  ;;  %v3187_v3 = vld [vmem:[#allocation5 + $0x4f0] sm:$0xf0]  ;;  %v3907_v4 = vld [vmem:[#allocation5 + $0x5e4] sm:$0xf]  ;;  %v2950_v14 = vor.u32 %v3815_v63, %v2947_v0 }
  0x71   :  { %1835 = vmatpush.bf16.msra.mxu3 %v2982_v45  ;;  %v3315_v6 = vld [vmem:[#allocation5 + $0x5f0] sm:$0xf0]  ;;  %v3939_v7 = vld [vmem:[#allocation5 + $0x6e4] sm:$0xf]  ;;  %v3190_v15 = vor.u32 %v3875_v2, %v3187_v3 }
  0x72   :  { %1794 = vmatpush.bf16.msra.mxu0 %v2582_v52  ;;  %v3443_v8 = vld [vmem:[#allocation5 + $0x6f0] sm:$0xf0]  ;;  %v3971_v12 = vld [vmem:[#allocation5 + $0x7e4] sm:$0xf]  ;;  %v3318_v16 = vor.u32 %v3907_v4, %v3315_v6 }
  0x73   :  { %1808 = vmatpush.bf16.msra.mxu1 %v2710_v55  ;;  %v3571_v13 = vld [vmem:[#allocation5 + $0x7f0] sm:$0xf0]  ;;  %v3446_v18 = vor.u32 %v3939_v7, %v3443_v8  ;;  %v3871_v19 = vld [vmem:[#allocation5 + $0x4c4] sm:$0xf] }
  0x74   :  { %1822 = vmatpush.bf16.msra.mxu2 %v2838_v56  ;;  %v3171_v20 = vld [vmem:[#allocation5 + $0x4d0] sm:$0xf0]  ;;  %v3903_v21 = vld [vmem:[#allocation5 + $0x5c4] sm:$0xf]  ;;  %v3574_v22 = vor.u32 %v3971_v12, %v3571_v13 }
  0x75   :  { %1836 = vmatpush.bf16.msra.mxu3 %v2966_v61  ;;  %v3299_v23 = vld [vmem:[#allocation5 + $0x5d0] sm:$0xf0]  ;;  %v3935_v24 = vld [vmem:[#allocation5 + $0x6c4] sm:$0xf]  ;;  %v3174_v28 = vor.u32 %v3871_v19, %v3171_v20 }
  0x76   :  { %1795 = vmatpush.bf16.msra.mxu0 %v2566_v5  ;;  %v3427_v25 = vld [vmem:[#allocation5 + $0x6d0] sm:$0xf0]  ;;  %v3967_v26 = vld [vmem:[#allocation5 + $0x7c4] sm:$0xf]  ;;  %v3302_v29 = vor.u32 %v3903_v21, %v3299_v23 }
  0x77   :  { %1809 = vmatpush.bf16.msra.mxu1 %v2694_v9  ;;  %v3555_v27 = vld [vmem:[#allocation5 + $0x7d0] sm:$0xf0]  ;;  %v3430_v30 = vor.u32 %v3935_v24, %v3427_v25  ;;  %v3867_v31 = vld [vmem:[#allocation5 + $0x4a4] sm:$0xf] }
  0x78   :  { %1823 = vmatpush.bf16.msra.mxu2 %v2822_v11  ;;  %v3155_v32 = vld [vmem:[#allocation5 + $0x4b0] sm:$0xf0]  ;;  %v3899_v33 = vld [vmem:[#allocation5 + $0x5a4] sm:$0xf]  ;;  %v3558_v34 = vor.u32 %v3967_v26, %v3555_v27 }
  0x79   :  { %1837 = vmatpush.bf16.msra.mxu3 %v2950_v14  ;;  %v3283_v35 = vld [vmem:[#allocation5 + $0x5b0] sm:$0xf0]  ;;  %v3931_v36 = vld [vmem:[#allocation5 + $0x6a4] sm:$0xf]  ;;  %1796 = vmatmul.bf16.vlgmr.msra.gmra.mxu0 %v4212_v58  ;;  %v3158_v41 = vor.u32 %v3867_v31, %v3155_v32 }
  0x7a   :  { %1844 = vmatpush.bf16.msrb.mxu0 %v3190_v15  ;;  %v3411_v37 = vld [vmem:[#allocation5 + $0x6b0] sm:$0xf0]  ;;  %v3963_v38 = vld [vmem:[#allocation5 + $0x7a4] sm:$0xf]  ;;  %1810 = vmatmul.bf16.vlgmr.msra.gmra.mxu1 %v4218_v10  ;;  %v3286_v42 = vor.u32 %v3899_v33, %v3283_v35 }
  0x7b   :  { %1858 = vmatpush.bf16.msrb.mxu1 %v3318_v16  ;;  %v3539_v40 = vld [vmem:[#allocation5 + $0x7b0] sm:$0xf0]  ;;  %1824 = vmatmul.bf16.vlgmr.msra.gmra.mxu2 %v4214_v1  ;;  %v3414_v45 = vor.u32 %v3931_v36, %v3411_v37  ;;  %v3863_v46 = vld [vmem:[#allocation5 + $0x484] sm:$0xf] }
  0x7c   :  { %1872 = vmatpush.bf16.msrb.mxu2 %v3446_v18  ;;  %1838 = vmatmul.bf16.vlgmr.msra.gmra.mxu3 %v4220_v17  ;;  %v3139_v48 = vld [vmem:[#allocation5 + $0x490] sm:$0xf0]  ;;  %v3895_v49 = vld [vmem:[#allocation5 + $0x584] sm:$0xf]  ;;  %v3542_v50 = vor.u32 %v3963_v38, %v3539_v40 }
  0x7d   :  { %1886 = vmatpush.bf16.msrb.mxu3 %v3574_v22  ;;  %v3267_v51 = vld [vmem:[#allocation5 + $0x590] sm:$0xf0]  ;;  %v3927_v52 = vld [vmem:[#allocation5 + $0x684] sm:$0xf]  ;;  %v3142_v56 = vor.u32 %v3863_v46, %v3139_v48  ;;  %v2681_v48 = vld [vmem:[#allocation5 + $0xe8] sm:$0xf] }
  0x7e   :  { %1845 = vmatpush.bf16.msrb.mxu0 %v3174_v28  ;;  %v3395_v53 = vld [vmem:[#allocation5 + $0x690] sm:$0xf0]  ;;  %v3959_v54 = vld [vmem:[#allocation5 + $0x784] sm:$0xf]  ;;  %v3270_v57 = vor.u32 %v3895_v49, %v3267_v51  ;;  %v3750_v49 = vld [vmem:[#allocation5 + $0xf4] sm:$0xf0] }
  0x7f   :  { %1859 = vmatpush.bf16.msrb.mxu1 %v3302_v29  ;;  %v3523_v55 = vld [vmem:[#allocation5 + $0x790] sm:$0xf0]  ;;  %v3398_v59 = vor.u32 %v3927_v52, %v3395_v53  ;;  %v3859_v60 = vld [vmem:[#allocation5 + $0x464] sm:$0xf]  ;;  %v3782_v52 = vld [vmem:[#allocation5 + $0x1f4] sm:$0xf0] }
  0x80   :  { %1873 = vmatpush.bf16.msrb.mxu2 %v3430_v30  ;;  %v3123_v61 = vld [vmem:[#allocation5 + $0x470] sm:$0xf0]  ;;  %v3891_v62 = vld [vmem:[#allocation5 + $0x564] sm:$0xf]  ;;  %v3526_v63 = vor.u32 %v3959_v54, %v3523_v55  ;;  %v2937_v53 = vld [vmem:[#allocation5 + $0x2e8] sm:$0xf] }
  0x81   :  { %1887 = vmatpush.bf16.msrb.mxu3 %v3558_v34  ;;  %v3251_v0 = vld [vmem:[#allocation5 + $0x570] sm:$0xf0]  ;;  %v3923_v2 = vld [vmem:[#allocation5 + $0x664] sm:$0xf]  ;;  %v3126_v6 = vor.u32 %v3859_v60, %v3123_v61  ;;  %v3814_v54 = vld [vmem:[#allocation5 + $0x2f4] sm:$0xf0]  ;;  %v2682_v61 = vor.u32 %v3750_v49, %v2681_v48 }
  0x82   :  { %1846 = vmatpush.bf16.msrb.mxu0 %v3158_v41  ;;  %v3379_v3 = vld [vmem:[#allocation5 + $0x670] sm:$0xf0]  ;;  %v3955_v4 = vld [vmem:[#allocation5 + $0x764] sm:$0xf]  ;;  %v3254_v7 = vor.u32 %v3891_v62, %v3251_v0  ;;  %v2665_v0 = vld [vmem:[#allocation5 + $0xc8] sm:$0xf] }
  0x83   :  { %1860 = vmatpush.bf16.msrb.mxu1 %v3286_v42  ;;  %v3507_v5 = vld [vmem:[#allocation5 + $0x770] sm:$0xf0]  ;;  %v3382_v8 = vor.u32 %v3923_v2, %v3379_v3  ;;  %v3855_v9 = vld [vmem:[#allocation5 + $0x444] sm:$0xf]  ;;  %v3746_v2 = vld [vmem:[#allocation5 + $0xd4] sm:$0xf0] }
  0x84   :  { %1874 = vmatpush.bf16.msrb.mxu2 %v3414_v45  ;;  %v3107_v11 = vld [vmem:[#allocation5 + $0x450] sm:$0xf0]  ;;  %v3887_v12 = vld [vmem:[#allocation5 + $0x544] sm:$0xf]  ;;  %v3510_v13 = vor.u32 %v3955_v4, %v3507_v5  ;;  %v2793_v3 = vld [vmem:[#allocation5 + $0x1c8] sm:$0xf] }
  0x85   :  { %1888 = vmatpush.bf16.msrb.mxu3 %v3542_v50  ;;  %v3235_v14 = vld [vmem:[#allocation5 + $0x550] sm:$0xf0]  ;;  %v3919_v15 = vld [vmem:[#allocation5 + $0x644] sm:$0xf]  ;;  %v3110_v20 = vor.u32 %v3855_v9, %v3107_v11  ;;  %v2809_v50 = vld [vmem:[#allocation5 + $0x1e8] sm:$0xf]  ;;  %v2666_v11 = vor.u32 %v3746_v2, %v2665_v0 }
  0x86   :  { %1847 = vmatpush.bf16.msrb.mxu0 %v3142_v56  ;;  %v3363_v16 = vld [vmem:[#allocation5 + $0x650] sm:$0xf0]  ;;  %v3951_v18 = vld [vmem:[#allocation5 + $0x744] sm:$0xf]  ;;  %v3238_v21 = vor.u32 %v3887_v12, %v3235_v14  ;;  %v2810_v62 = vor.u32 %v3782_v52, %v2809_v50  ;;  %v3778_v5 = vld [vmem:[#allocation5 + $0x1d4] sm:$0xf0] }
  0x87   :  { %1861 = vmatpush.bf16.msrb.mxu1 %v3270_v57  ;;  %v3491_v19 = vld [vmem:[#allocation5 + $0x750] sm:$0xf0]  ;;  %v3366_v22 = vor.u32 %v3919_v15, %v3363_v16  ;;  %v3851_v23 = vld [vmem:[#allocation5 + $0x424] sm:$0xf]  ;;  %v3065_v57 = vld [vmem:[#allocation5 + $0x3e8] sm:$0xf]  ;;  %v2794_v12 = vor.u32 %v3778_v5, %v2793_v3 }
  0x88   :  { %1875 = vmatpush.bf16.msrb.mxu2 %v3398_v59  ;;  %v3091_v24 = vld [vmem:[#allocation5 + $0x430] sm:$0xf0]  ;;  %v3883_v25 = vld [vmem:[#allocation5 + $0x524] sm:$0xf]  ;;  %v3494_v26 = vor.u32 %v3951_v18, %v3491_v19  ;;  %v3846_v59 = vld [vmem:[#allocation5 + $0x3f4] sm:$0xf0] }
  0x89   :  { %1889 = vmatpush.bf16.msrb.mxu3 %v3526_v63  ;;  %v3219_v27 = vld [vmem:[#allocation5 + $0x530] sm:$0xf0]  ;;  %v3915_v28 = vld [vmem:[#allocation5 + $0x624] sm:$0xf]  ;;  %v3094_v32 = vor.u32 %v3851_v23, %v3091_v24  ;;  %v2938_v63 = vor.u32 %v3814_v54, %v2937_v53  ;;  %v3066_v4 = vor.u32 %v3846_v59, %v3065_v57  ;;  %v3842_v9 = vld [vmem:[#allocation5 + $0x3d4] sm:$0xf0] }
  0x8a   :  { %1848 = vmatpush.bf16.msrb.mxu0 %v3126_v6  ;;  %v3347_v29 = vld [vmem:[#allocation5 + $0x630] sm:$0xf0]  ;;  %v3947_v30 = vld [vmem:[#allocation5 + $0x724] sm:$0xf]  ;;  %v3222_v35 = vor.u32 %v3883_v25, %v3219_v27  ;;  %v2921_v6 = vld [vmem:[#allocation5 + $0x2c8] sm:$0xf] }
  0x8b   :  { %1862 = vmatpush.bf16.msrb.mxu1 %v3254_v7  ;;  %v3475_v31 = vld [vmem:[#allocation5 + $0x730] sm:$0xf0]  ;;  %v3847_v33 = vld [vmem:[#allocation5 + $0x404] sm:$0xf]  ;;  %v3350_v36 = vor.u32 %v3915_v28, %v3347_v29  ;;  %v3810_v7 = vld [vmem:[#allocation5 + $0x2d4] sm:$0xf0] }
  0x8c   :  { %1876 = vmatpush.bf16.msrb.mxu2 %v3382_v8  ;;  %v3075_v34 = vld [vmem:[#allocation5 + $0x410] sm:$0xf0]  ;;  %v3879_v37 = vld [vmem:[#allocation5 + $0x504] sm:$0xf]  ;;  %v3478_v41 = vor.u32 %v3947_v30, %v3475_v31  ;;  %v3049_v8 = vld [vmem:[#allocation5 + $0x3c8] sm:$0xf] }
  0x8d   :  { %1890 = vmatpush.bf16.msrb.mxu3 %v3510_v13  ;;  %v3203_v38 = vld [vmem:[#allocation5 + $0x510] sm:$0xf0]  ;;  %v3911_v40 = vld [vmem:[#allocation5 + $0x604] sm:$0xf]  ;;  %v3078_v51 = vor.u32 %v3847_v33, %v3075_v34  ;;  %v2922_v13 = vor.u32 %v3810_v7, %v2921_v6  ;;  %v2649_v14 = vld [vmem:[#allocation5 + $0xa8] sm:$0xf]  ;;  %v3050_v18 = vor.u32 %v3842_v9, %v3049_v8 }
  0x8e   :  { %1849 = vmatpush.bf16.msrb.mxu0 %v3110_v20  ;;  %v3331_v42 = vld [vmem:[#allocation5 + $0x610] sm:$0xf0]  ;;  %v3943_v45 = vld [vmem:[#allocation5 + $0x704] sm:$0xf]  ;;  %v3206_v55 = vor.u32 %v3879_v37, %v3203_v38  ;;  %v3742_v15 = vld [vmem:[#allocation5 + $0xb4] sm:$0xf0] }
  0x8f   :  { %1863 = vmatpush.bf16.msrb.mxu1 %v3238_v21  ;;  %v3459_v46 = vld [vmem:[#allocation5 + $0x710] sm:$0xf0]  ;;  %v3334_v56 = vor.u32 %v3911_v40, %v3331_v42  ;;  %v2777_v16 = vld [vmem:[#allocation5 + $0x1a8] sm:$0xf]  ;;  %v3774_v19 = vld [vmem:[#allocation5 + $0x1b4] sm:$0xf0]  ;;  %v2650_v24 = vor.u32 %v3742_v15, %v2649_v14 }
  0x90   :  { %1877 = vmatpush.bf16.msrb.mxu2 %v3366_v22  ;;  %v3462_v60 = vor.u32 %v3943_v45, %v3459_v46  ;;  %v2905_v20 = vld [vmem:[#allocation5 + $0x2a8] sm:$0xf]  ;;  %v3806_v21 = vld [vmem:[#allocation5 + $0x2b4] sm:$0xf0]  ;;  %v2778_v25 = vor.u32 %v3774_v19, %v2777_v16 }
  0x91   :  { %1891 = vmatpush.bf16.msrb.mxu3 %v3494_v26  ;;  %v3033_v22 = vld [vmem:[#allocation5 + $0x3a8] sm:$0xf]  ;;  %v3838_v23 = vld [vmem:[#allocation5 + $0x3b4] sm:$0xf0]  ;;  %v2906_v26 = vor.u32 %v3806_v21, %v2905_v20 }
  0x92   :  { %1850 = vmatpush.bf16.msrb.mxu0 %v3094_v32  ;;  %v2633_v27 = vld [vmem:[#allocation5 + $0x88] sm:$0xf]  ;;  %v3738_v28 = vld [vmem:[#allocation5 + $0x94] sm:$0xf0]  ;;  %v3034_v30 = vor.u32 %v3838_v23, %v3033_v22 }
  0x93   :  { %1864 = vmatpush.bf16.msrb.mxu1 %v3222_v35  ;;  %v2761_v29 = vld [vmem:[#allocation5 + $0x188] sm:$0xf]  ;;  %v3770_v31 = vld [vmem:[#allocation5 + $0x194] sm:$0xf0] }
  0x94   :  { %1878 = vmatpush.bf16.msrb.mxu2 %v3350_v36  ;;  %v2889_v32 = vld [vmem:[#allocation5 + $0x288] sm:$0xf]  ;;  %v3802_v33 = vld [vmem:[#allocation5 + $0x294] sm:$0xf0]  ;;  %v2634_v36 = vor.u32 %v3738_v28, %v2633_v27  ;;  %v2762_v37 = vor.u32 %v3770_v31, %v2761_v29 }
  0x95   :  { %1892 = vmatpush.bf16.msrb.mxu3 %v3478_v41  ;;  %v3017_v34 = vld [vmem:[#allocation5 + $0x388] sm:$0xf]  ;;  %v3834_v35 = vld [vmem:[#allocation5 + $0x394] sm:$0xf0]  ;;  %v2890_v38 = vor.u32 %v3802_v33, %v2889_v32 }
  0x96   :  { %1851 = vmatpush.bf16.msrb.mxu0 %v3078_v51  ;;  %v2617_v40 = vld [vmem:[#allocation5 + $0x68] sm:$0xf]  ;;  %v3734_v41 = vld [vmem:[#allocation5 + $0x74] sm:$0xf0]  ;;  %v3018_v45 = vor.u32 %v3834_v35, %v3017_v34 }
  0x97   :  { %1865 = vmatpush.bf16.msrb.mxu1 %v3206_v55  ;;  %v2745_v42 = vld [vmem:[#allocation5 + $0x168] sm:$0xf]  ;;  %v3766_v46 = vld [vmem:[#allocation5 + $0x174] sm:$0xf0]  ;;  %v2618_v52 = vor.u32 %v3734_v41, %v2617_v40 }
  0x98   :  { %1879 = vmatpush.bf16.msrb.mxu2 %v3334_v56  ;;  %v2873_v48 = vld [vmem:[#allocation5 + $0x268] sm:$0xf]  ;;  %v3798_v49 = vld [vmem:[#allocation5 + $0x274] sm:$0xf0]  ;;  %v2746_v53 = vor.u32 %v3766_v46, %v2745_v42 }
  0x99   :  { %1893 = vmatpush.bf16.msrb.mxu3 %v3462_v60  ;;  %1852 = vmatmul.bf16.vlgmr.msrb.gmra.mxu0 %v4224_v39  ;;  %v3001_v50 = vld [vmem:[#allocation5 + $0x368] sm:$0xf]  ;;  %v3830_v51 = vld [vmem:[#allocation5 + $0x374] sm:$0xf0]  ;;  %v2874_v54 = vor.u32 %v3798_v49, %v2873_v48 }
  0x9a   :  { %1900 = vmatpush.bf16.msra.mxu0 %v2682_v61  ;;  %1866 = vmatmul.bf16.vlgmr.msrb.gmra.mxu1 %v4228_v44  ;;  %v2601_v55 = vld [vmem:[#allocation5 + $0x48] sm:$0xf]  ;;  %v3730_v56 = vld [vmem:[#allocation5 + $0x54] sm:$0xf0]  ;;  %v3002_v59 = vor.u32 %v3830_v51, %v3001_v50 }
  0x9b   :  { %1914 = vmatpush.bf16.msra.mxu1 %v2810_v62  ;;  %1880 = vmatmul.bf16.vlgmr.msrb.gmra.mxu2 %v4226_v43  ;;  %v2729_v57 = vld [vmem:[#allocation5 + $0x148] sm:$0xf]  ;;  %v3762_v60 = vld [vmem:[#allocation5 + $0x154] sm:$0xf0]  ;;  %v2602_v2 = vor.u32 %v3730_v56, %v2601_v55 }
  0x9c   :  { %1928 = vmatpush.bf16.msra.mxu2 %v2938_v63  ;;  %1894 = vmatmul.bf16.vlgmr.msrb.gmra.mxu3 %v4230_v47  ;;  %v2857_v61 = vld [vmem:[#allocation5 + $0x248] sm:$0xf]  ;;  %v3794_v62 = vld [vmem:[#allocation5 + $0x254] sm:$0xf0]  ;;  %v2730_v3 = vor.u32 %v3762_v60, %v2729_v57 }
  0x9d   :  { %1942 = vmatpush.bf16.msra.mxu3 %v3066_v4  ;;  %v2985_v63 = vld [vmem:[#allocation5 + $0x348] sm:$0xf]  ;;  %v3826_v0 = vld [vmem:[#allocation5 + $0x354] sm:$0xf0]  ;;  %v2858_v4 = vor.u32 %v3794_v62, %v2857_v61 }
  0x9e   :  { %1901 = vmatpush.bf16.msra.mxu0 %v2666_v11  ;;  %v2585_v5 = vld [vmem:[#allocation5 + $0x28] sm:$0xf]  ;;  %v3726_v6 = vld [vmem:[#allocation5 + $0x34] sm:$0xf0]  ;;  %v2986_v8 = vor.u32 %v3826_v0, %v2985_v63 }
  0x9f   :  { %1915 = vmatpush.bf16.msra.mxu1 %v2794_v12  ;;  %v2713_v7 = vld [vmem:[#allocation5 + $0x128] sm:$0xf]  ;;  %v3758_v9 = vld [vmem:[#allocation5 + $0x134] sm:$0xf0]  ;;  %v2586_v15 = vor.u32 %v3726_v6, %v2585_v5 }
  0xa0   :  { %1929 = vmatpush.bf16.msra.mxu2 %v2922_v13  ;;  %v2841_v11 = vld [vmem:[#allocation5 + $0x228] sm:$0xf]  ;;  %v3790_v12 = vld [vmem:[#allocation5 + $0x234] sm:$0xf0]  ;;  %v2714_v19 = vor.u32 %v3758_v9, %v2713_v7 }
  0xa1   :  { %1943 = vmatpush.bf16.msra.mxu3 %v3050_v18  ;;  %v2969_v13 = vld [vmem:[#allocation5 + $0x328] sm:$0xf]  ;;  %v3822_v14 = vld [vmem:[#allocation5 + $0x334] sm:$0xf0]  ;;  %v2842_v20 = vor.u32 %v3790_v12, %v2841_v11 }
  0xa2   :  { %1902 = vmatpush.bf16.msra.mxu0 %v2650_v24  ;;  %v2569_v16 = vld [vmem:[#allocation5 + $0x8] sm:$0xf]  ;;  %v3722_v18 = vld [vmem:[#allocation5 + $0x14] sm:$0xf0]  ;;  %v2970_v24 = vor.u32 %v3822_v14, %v2969_v13 }
  0xa3   :  { %1916 = vmatpush.bf16.msra.mxu1 %v2778_v25  ;;  %v2697_v21 = vld [vmem:[#allocation5 + $0x108] sm:$0xf]  ;;  %v3754_v22 = vld [vmem:[#allocation5 + $0x114] sm:$0xf0]  ;;  %v2570_v31 = vor.u32 %v3722_v18, %v2569_v16 }
  0xa4   :  { %1930 = vmatpush.bf16.msra.mxu2 %v2906_v26  ;;  %v2825_v23 = vld [vmem:[#allocation5 + $0x208] sm:$0xf]  ;;  %v3786_v25 = vld [vmem:[#allocation5 + $0x214] sm:$0xf0]  ;;  %v2698_v35 = vor.u32 %v3754_v22, %v2697_v21 }
  0xa5   :  { %1944 = vmatpush.bf16.msra.mxu3 %v3034_v30  ;;  %v2953_v26 = vld [vmem:[#allocation5 + $0x308] sm:$0xf]  ;;  %v3818_v27 = vld [vmem:[#allocation5 + $0x314] sm:$0xf0] }
  0xa6   :  { %1903 = vmatpush.bf16.msra.mxu0 %v2634_v36  ;;  %v3193_v28 = vld [vmem:[#allocation5 + $0x4e8] sm:$0xf]  ;;  %v3878_v29 = vld [vmem:[#allocation5 + $0x4f4] sm:$0xf0]  ;;  %v2826_v36 = vor.u32 %v3786_v25, %v2825_v23  ;;  %v2954_v40 = vor.u32 %v3818_v27, %v2953_v26 }
  0xa7   :  { %1917 = vmatpush.bf16.msra.mxu1 %v2762_v37  ;;  %v3321_v30 = vld [vmem:[#allocation5 + $0x5e8] sm:$0xf]  ;;  %v3910_v32 = vld [vmem:[#allocation5 + $0x5f4] sm:$0xf0]  ;;  %v3194_v41 = vor.u32 %v3878_v29, %v3193_v28 }
  0xa8   :  { %1931 = vmatpush.bf16.msra.mxu2 %v2890_v38  ;;  %v3449_v33 = vld [vmem:[#allocation5 + $0x6e8] sm:$0xf]  ;;  %v3942_v34 = vld [vmem:[#allocation5 + $0x6f4] sm:$0xf0]  ;;  %v3322_v42 = vor.u32 %v3910_v32, %v3321_v30 }
  0xa9   :  { %1945 = vmatpush.bf16.msra.mxu3 %v3018_v45  ;;  %v3577_v37 = vld [vmem:[#allocation5 + $0x7e8] sm:$0xf]  ;;  %v3974_v38 = vld [vmem:[#allocation5 + $0x7f4] sm:$0xf0]  ;;  %v3450_v45 = vor.u32 %v3942_v34, %v3449_v33 }
  0xaa   :  { %1904 = vmatpush.bf16.msra.mxu0 %v2618_v52  ;;  %v3177_v46 = vld [vmem:[#allocation5 + $0x4c8] sm:$0xf]  ;;  %v3874_v48 = vld [vmem:[#allocation5 + $0x4d4] sm:$0xf0]  ;;  %v3578_v50 = vor.u32 %v3974_v38, %v3577_v37 }
  0xab   :  { %1918 = vmatpush.bf16.msra.mxu1 %v2746_v53  ;;  %v3305_v49 = vld [vmem:[#allocation5 + $0x5c8] sm:$0xf]  ;;  %v3906_v51 = vld [vmem:[#allocation5 + $0x5d4] sm:$0xf0]  ;;  %v3178_v56 = vor.u32 %v3874_v48, %v3177_v46 }
  0xac   :  { %1932 = vmatpush.bf16.msra.mxu2 %v2874_v54  ;;  %v3433_v52 = vld [vmem:[#allocation5 + $0x6c8] sm:$0xf]  ;;  %v3938_v53 = vld [vmem:[#allocation5 + $0x6d4] sm:$0xf0]  ;;  %v3306_v57 = vor.u32 %v3906_v51, %v3305_v49 }
  0xad   :  { %1946 = vmatpush.bf16.msra.mxu3 %v3002_v59  ;;  %v3561_v54 = vld [vmem:[#allocation5 + $0x7c8] sm:$0xf]  ;;  %v3970_v55 = vld [vmem:[#allocation5 + $0x7d4] sm:$0xf0]  ;;  %v3434_v59 = vor.u32 %v3938_v53, %v3433_v52 }
  0xae   :  { %1905 = vmatpush.bf16.msra.mxu0 %v2602_v2  ;;  %v3161_v60 = vld [vmem:[#allocation5 + $0x4a8] sm:$0xf]  ;;  %v3870_v61 = vld [vmem:[#allocation5 + $0x4b4] sm:$0xf0]  ;;  %v3562_v63 = vor.u32 %v3970_v55, %v3561_v54 }
  0xaf   :  { %1919 = vmatpush.bf16.msra.mxu1 %v2730_v3  ;;  %v3289_v62 = vld [vmem:[#allocation5 + $0x5a8] sm:$0xf]  ;;  %v3902_v0 = vld [vmem:[#allocation5 + $0x5b4] sm:$0xf0]  ;;  %v3162_v6 = vor.u32 %v3870_v61, %v3161_v60 }
  0xb0   :  { %1933 = vmatpush.bf16.msra.mxu2 %v2858_v4  ;;  %v3417_v2 = vld [vmem:[#allocation5 + $0x6a8] sm:$0xf]  ;;  %v3934_v3 = vld [vmem:[#allocation5 + $0x6b4] sm:$0xf0]  ;;  %v3290_v7 = vor.u32 %v3902_v0, %v3289_v62 }
  0xb1   :  { %1947 = vmatpush.bf16.msra.mxu3 %v2986_v8  ;;  %v3545_v4 = vld [vmem:[#allocation5 + $0x7a8] sm:$0xf]  ;;  %v3966_v5 = vld [vmem:[#allocation5 + $0x7b4] sm:$0xf0]  ;;  %v3418_v8 = vor.u32 %v3934_v3, %v3417_v2 }
  0xb2   :  { %1906 = vmatpush.bf16.msra.mxu0 %v2586_v15  ;;  %v3145_v9 = vld [vmem:[#allocation5 + $0x488] sm:$0xf]  ;;  %v3866_v11 = vld [vmem:[#allocation5 + $0x494] sm:$0xf0]  ;;  %v3546_v13 = vor.u32 %v3966_v5, %v3545_v4 }
  0xb3   :  { %1920 = vmatpush.bf16.msra.mxu1 %v2714_v19  ;;  %v3273_v12 = vld [vmem:[#allocation5 + $0x588] sm:$0xf]  ;;  %v3898_v14 = vld [vmem:[#allocation5 + $0x594] sm:$0xf0] }
  0xb4   :  { %1934 = vmatpush.bf16.msra.mxu2 %v2842_v20  ;;  %v3401_v15 = vld [vmem:[#allocation5 + $0x688] sm:$0xf]  ;;  %v3930_v16 = vld [vmem:[#allocation5 + $0x694] sm:$0xf0]  ;;  %v3146_v20 = vor.u32 %v3866_v11, %v3145_v9  ;;  %v3274_v21 = vor.u32 %v3898_v14, %v3273_v12  ;;  %v3748_v11 = vld [vmem:[#allocation5 + $0xec] sm:$0xf] }
  0xb5   :  { %1948 = vmatpush.bf16.msra.mxu3 %v2970_v24  ;;  %v3529_v18 = vld [vmem:[#allocation5 + $0x788] sm:$0xf]  ;;  %v3962_v19 = vld [vmem:[#allocation5 + $0x794] sm:$0xf0]  ;;  %v3402_v22 = vor.u32 %v3930_v16, %v3401_v15  ;;  %v2683_v12 = vld [vmem:[#allocation5 + $0xf8] sm:$0xf0] }
  0xb6   :  { %1907 = vmatpush.bf16.msra.mxu0 %v2570_v31  ;;  %v3129_v23 = vld [vmem:[#allocation5 + $0x468] sm:$0xf]  ;;  %v3862_v24 = vld [vmem:[#allocation5 + $0x474] sm:$0xf0]  ;;  %v3530_v26 = vor.u32 %v3962_v19, %v3529_v18  ;;  %v2811_v15 = vld [vmem:[#allocation5 + $0x1f8] sm:$0xf0] }
  0xb7   :  { %1921 = vmatpush.bf16.msra.mxu1 %v2698_v35  ;;  %v3257_v25 = vld [vmem:[#allocation5 + $0x568] sm:$0xf]  ;;  %v3894_v27 = vld [vmem:[#allocation5 + $0x574] sm:$0xf0]  ;;  %v3130_v32 = vor.u32 %v3862_v24, %v3129_v23  ;;  %v3812_v16 = vld [vmem:[#allocation5 + $0x2ec] sm:$0xf]  ;;  %v2686_v24 = vor.u32 %v3748_v11, %v2683_v12 }
  0xb8   :  { %1935 = vmatpush.bf16.msra.mxu2 %v2826_v36  ;;  %v3385_v28 = vld [vmem:[#allocation5 + $0x668] sm:$0xf]  ;;  %v3926_v29 = vld [vmem:[#allocation5 + $0x674] sm:$0xf0]  ;;  %v3258_v33 = vor.u32 %v3894_v27, %v3257_v25  ;;  %v2939_v18 = vld [vmem:[#allocation5 + $0x2f8] sm:$0xf0] }
  0xb9   :  { %1949 = vmatpush.bf16.msra.mxu3 %v2954_v40  ;;  %1908 = vmatmul.bf16.vlgmr.msra.gmra.mxu0 %v4212_v58  ;;  %v3513_v30 = vld [vmem:[#allocation5 + $0x768] sm:$0xf]  ;;  %v3958_v31 = vld [vmem:[#allocation5 + $0x774] sm:$0xf0]  ;;  %v3386_v34 = vor.u32 %v3926_v29, %v3385_v28  ;;  %v3744_v27 = vld [vmem:[#allocation5 + $0xcc] sm:$0xf] }
  0xba   :  { %1956 = vmatpush.bf16.msrb.mxu0 %v3194_v41  ;;  %1922 = vmatmul.bf16.vlgmr.msra.gmra.mxu1 %v4218_v10  ;;  %v3113_v35 = vld [vmem:[#allocation5 + $0x448] sm:$0xf]  ;;  %v3858_v36 = vld [vmem:[#allocation5 + $0x454] sm:$0xf0]  ;;  %v3514_v38 = vor.u32 %v3958_v31, %v3513_v30  ;;  %v2667_v28 = vld [vmem:[#allocation5 + $0xd8] sm:$0xf0] }
  0xbb   :  { %1970 = vmatpush.bf16.msrb.mxu1 %v3322_v42  ;;  %1936 = vmatmul.bf16.vlgmr.msra.gmra.mxu2 %v4214_v1  ;;  %v3241_v37 = vld [vmem:[#allocation5 + $0x548] sm:$0xf]  ;;  %v3890_v40 = vld [vmem:[#allocation5 + $0x554] sm:$0xf0]  ;;  %v3114_v48 = vor.u32 %v3858_v36, %v3113_v35  ;;  %v3776_v29 = vld [vmem:[#allocation5 + $0x1cc] sm:$0xf]  ;;  %v2670_v36 = vor.u32 %v3744_v27, %v2667_v28 }
  0xbc   :  { %1984 = vmatpush.bf16.msrb.mxu2 %v3450_v45  ;;  %1950 = vmatmul.bf16.vlgmr.msra.gmra.mxu3 %v4220_v17  ;;  %v3369_v41 = vld [vmem:[#allocation5 + $0x648] sm:$0xf]  ;;  %v3922_v42 = vld [vmem:[#allocation5 + $0x654] sm:$0xf0]  ;;  %v3242_v49 = vor.u32 %v3890_v40, %v3241_v37  ;;  %v2795_v31 = vld [vmem:[#allocation5 + $0x1d8] sm:$0xf0] }
  0xbd   :  { %1998 = vmatpush.bf16.msrb.mxu3 %v3578_v50  ;;  %v3497_v45 = vld [vmem:[#allocation5 + $0x748] sm:$0xf]  ;;  %v3954_v46 = vld [vmem:[#allocation5 + $0x754] sm:$0xf0]  ;;  %v3370_v50 = vor.u32 %v3922_v42, %v3369_v41  ;;  %v3051_v35 = vld [vmem:[#allocation5 + $0x3d8] sm:$0xf0]  ;;  %v2798_v37 = vor.u32 %v3776_v29, %v2795_v31 }
  0xbe   :  { %1957 = vmatpush.bf16.msrb.mxu0 %v3178_v56  ;;  %v3097_v51 = vld [vmem:[#allocation5 + $0x428] sm:$0xf]  ;;  %v3854_v52 = vld [vmem:[#allocation5 + $0x434] sm:$0xf0]  ;;  %v3498_v54 = vor.u32 %v3954_v46, %v3497_v45  ;;  %v3740_v40 = vld [vmem:[#allocation5 + $0xac] sm:$0xf] }
  0xbf   :  { %1971 = vmatpush.bf16.msrb.mxu1 %v3306_v57  ;;  %v3225_v53 = vld [vmem:[#allocation5 + $0x528] sm:$0xf]  ;;  %v3886_v55 = vld [vmem:[#allocation5 + $0x534] sm:$0xf0]  ;;  %v3098_v61 = vor.u32 %v3854_v52, %v3097_v51  ;;  %v2651_v41 = vld [vmem:[#allocation5 + $0xb8] sm:$0xf0] }
  0xc0   :  { %1985 = vmatpush.bf16.msrb.mxu2 %v3434_v59  ;;  %v3353_v56 = vld [vmem:[#allocation5 + $0x628] sm:$0xf]  ;;  %v3918_v57 = vld [vmem:[#allocation5 + $0x634] sm:$0xf0]  ;;  %v3226_v0 = vor.u32 %v3886_v55, %v3225_v53  ;;  %v3772_v42 = vld [vmem:[#allocation5 + $0x1ac] sm:$0xf]  ;;  %v2654_v52 = vor.u32 %v3740_v40, %v2651_v41 }
  0xc1   :  { %1999 = vmatpush.bf16.msrb.mxu3 %v3562_v63  ;;  %v3481_v59 = vld [vmem:[#allocation5 + $0x728] sm:$0xf]  ;;  %v3950_v60 = vld [vmem:[#allocation5 + $0x734] sm:$0xf0]  ;;  %v3354_v2 = vor.u32 %v3918_v57, %v3353_v56  ;;  %v2779_v46 = vld [vmem:[#allocation5 + $0x1b8] sm:$0xf0] }
  0xc2   :  { %1958 = vmatpush.bf16.msrb.mxu0 %v3162_v6  ;;  %v3081_v62 = vld [vmem:[#allocation5 + $0x408] sm:$0xf]  ;;  %v3850_v63 = vld [vmem:[#allocation5 + $0x414] sm:$0xf0]  ;;  %v3482_v6 = vor.u32 %v3950_v60, %v3481_v59  ;;  %v3035_v51 = vld [vmem:[#allocation5 + $0x3b8] sm:$0xf0]  ;;  %v2782_v53 = vor.u32 %v3772_v42, %v2779_v46 }
  0xc3   :  { %1972 = vmatpush.bf16.msrb.mxu1 %v3290_v7  ;;  %v3209_v3 = vld [vmem:[#allocation5 + $0x508] sm:$0xf]  ;;  %v3882_v4 = vld [vmem:[#allocation5 + $0x514] sm:$0xf0]  ;;  %v3082_v14 = vor.u32 %v3850_v63, %v3081_v62  ;;  %v3736_v55 = vld [vmem:[#allocation5 + $0x8c] sm:$0xf] }
  0xc4   :  { %1986 = vmatpush.bf16.msrb.mxu2 %v3418_v8  ;;  %v3337_v5 = vld [vmem:[#allocation5 + $0x608] sm:$0xf]  ;;  %v3914_v7 = vld [vmem:[#allocation5 + $0x614] sm:$0xf0]  ;;  %v3210_v19 = vor.u32 %v3882_v4, %v3209_v3  ;;  %v2635_v56 = vld [vmem:[#allocation5 + $0x98] sm:$0xf0]  ;;  %v4252_v3 = vpop.f32.mrf.mxu0 }
  0xc5   :  { %2000 = vmatpush.bf16.msrb.mxu3 %v3546_v13  ;;  %v3465_v8 = vld [vmem:[#allocation5 + $0x708] sm:$0xf]  ;;  %v3946_v9 = vld [vmem:[#allocation5 + $0x714] sm:$0xf0]  ;;  %v3780_v13 = vld [vmem:[#allocation5 + $0x1ec] sm:$0xf] }
  0xc6   :  { %1959 = vmatpush.bf16.msrb.mxu0 %v3146_v20  ;;  %v3338_v20 = vor.u32 %v3914_v7, %v3337_v5  ;;  %v3466_v23 = vor.u32 %v3946_v9, %v3465_v8  ;;  %v2814_v25 = vor.u32 %v3780_v13, %v2811_v15  ;;  %v3768_v57 = vld [vmem:[#allocation5 + $0x18c] sm:$0xf]  ;;  %v2763_v60 = vld [vmem:[#allocation5 + $0x198] sm:$0xf0]  ;;  %v4254_v9 = vpop.f32.mrf.mxu1 }
  0xc7   :  { %1973 = vmatpush.bf16.msrb.mxu1 %v3274_v21  ;;  %v3844_v21 = vld [vmem:[#allocation5 + $0x3ec] sm:$0xf]  ;;  %v2891_v62 = vld [vmem:[#allocation5 + $0x298] sm:$0xf0]  ;;  %v2766_v4 = vor.u32 %v3768_v57, %v2763_v60 }
  0xc8   :  { %1987 = vmatpush.bf16.msrb.mxu2 %v3402_v22  ;;  %v3067_v22 = vld [vmem:[#allocation5 + $0x3f8] sm:$0xf0]  ;;  %v3832_v63 = vld [vmem:[#allocation5 + $0x38c] sm:$0xf] }
  0xc9   :  { %2001 = vmatpush.bf16.msrb.mxu3 %v3530_v26  ;;  %v2942_v26 = vor.u32 %v3812_v16, %v2939_v18  ;;  %v3070_v30 = vor.u32 %v3844_v21, %v3067_v22  ;;  %v2619_v7 = vld [vmem:[#allocation5 + $0x78] sm:$0xf0]  ;;  %v3764_v8 = vld [vmem:[#allocation5 + $0x16c] sm:$0xf] }
  0xca   :  { %1960 = vmatpush.bf16.msrb.mxu0 %v3130_v32  ;;  %v3808_v32 = vld [vmem:[#allocation5 + $0x2cc] sm:$0xf]  ;;  %v2747_v12 = vld [vmem:[#allocation5 + $0x178] sm:$0xf0] }
  0xcb   :  { %1974 = vmatpush.bf16.msrb.mxu1 %v3258_v33  ;;  %v2923_v33 = vld [vmem:[#allocation5 + $0x2d8] sm:$0xf0]  ;;  %v3796_v13 = vld [vmem:[#allocation5 + $0x26c] sm:$0xf] }
  0xcc   :  { %1988 = vmatpush.bf16.msrb.mxu2 %v3386_v34  ;;  %v3840_v34 = vld [vmem:[#allocation5 + $0x3cc] sm:$0xf]  ;;  %v3003_v16 = vld [vmem:[#allocation5 + $0x378] sm:$0xf0] }
  0xcd   :  { %2002 = vmatpush.bf16.msrb.mxu3 %v3514_v38  ;;  %v2926_v38 = vor.u32 %v3808_v32, %v2923_v33  ;;  %v3054_v45 = vor.u32 %v3840_v34, %v3051_v35  ;;  %v3828_v15 = vld [vmem:[#allocation5 + $0x36c] sm:$0xf]  ;;  %v2603_v22 = vld [vmem:[#allocation5 + $0x58] sm:$0xf0]  ;;  %v4258_v32 = vpop.f32.mrf.mxu3 }
  0xce   :  { %1961 = vmatpush.bf16.msrb.mxu0 %v3114_v48  ;;  %v3804_v48 = vld [vmem:[#allocation5 + $0x2ac] sm:$0xf]  ;;  %v2859_v27 = vld [vmem:[#allocation5 + $0x258] sm:$0xf0] }
  0xcf   :  { %1975 = vmatpush.bf16.msrb.mxu1 %v3242_v49  ;;  %v2907_v49 = vld [vmem:[#allocation5 + $0x2b8] sm:$0xf0]  ;;  %v3728_v21 = vld [vmem:[#allocation5 + $0x4c] sm:$0xf] }
  0xd0   :  { %1989 = vmatpush.bf16.msrb.mxu2 %v3370_v50  ;;  %v3836_v50 = vld [vmem:[#allocation5 + $0x3ac] sm:$0xf]  ;;  %v2987_v29 = vld [vmem:[#allocation5 + $0x358] sm:$0xf0]  ;;  %v2606_v31 = vor.u32 %v3728_v21, %v2603_v22 }
  0xd1   :  { %2003 = vmatpush.bf16.msrb.mxu3 %v3498_v54  ;;  %v2910_v54 = vor.u32 %v3804_v48, %v2907_v49  ;;  %v3038_v59 = vor.u32 %v3836_v50, %v3035_v51  ;;  %v3824_v28 = vld [vmem:[#allocation5 + $0x34c] sm:$0xf]  ;;  %v2715_v40 = vld [vmem:[#allocation5 + $0x138] sm:$0xf0]  ;;  %v4262_v49 = vpop.f32.mrf.mxu1 }
  0xd2   :  { %1962 = vmatpush.bf16.msrb.mxu0 %v3098_v61  ;;  %v3800_v61 = vld [vmem:[#allocation5 + $0x28c] sm:$0xf]  ;;  %v2843_v42 = vld [vmem:[#allocation5 + $0x238] sm:$0xf0] }
  0xd3   :  { %1976 = vmatpush.bf16.msrb.mxu1 %v3226_v0  ;;  %v3019_v0 = vld [vmem:[#allocation5 + $0x398] sm:$0xf0]  ;;  %v2894_v5 = vor.u32 %v3800_v61, %v2891_v62  ;;  %v3724_v35 = vld [vmem:[#allocation5 + $0x2c] sm:$0xf] }
  0xd4   :  { %1990 = vmatpush.bf16.msrb.mxu2 %v3354_v2  ;;  %v2638_v2 = vor.u32 %v3736_v55, %v2635_v56  ;;  %v3022_v11 = vor.u32 %v3832_v63, %v3019_v0  ;;  %v3788_v41 = vld [vmem:[#allocation5 + $0x22c] sm:$0xf]  ;;  %v2971_v48 = vld [vmem:[#allocation5 + $0x338] sm:$0xf0] }
  0xd5   :  { %2004 = vmatpush.bf16.msrb.mxu3 %v3482_v6  ;;  %v3732_v6 = vld [vmem:[#allocation5 + $0x6c] sm:$0xf]  ;;  %v2699_v56 = vld [vmem:[#allocation5 + $0x118] sm:$0xf0] }
  0xd6   :  { %1963 = vmatpush.bf16.msrb.mxu0 %v3082_v14  ;;  %v2875_v14 = vld [vmem:[#allocation5 + $0x278] sm:$0xf0]  ;;  %v2622_v18 = vor.u32 %v3732_v6, %v2619_v7  ;;  %v3820_v46 = vld [vmem:[#allocation5 + $0x32c] sm:$0xf] }
  0xd7   :  { %1977 = vmatpush.bf16.msrb.mxu1 %v3210_v19  ;;  %v2750_v19 = vor.u32 %v3764_v8, %v2747_v12  ;;  %v3720_v51 = vld [vmem:[#allocation5 + $0xc] sm:$0xf]  ;;  %v2827_v60 = vld [vmem:[#allocation5 + $0x218] sm:$0xf0] }
  0xd8   :  { %1991 = vmatpush.bf16.msrb.mxu2 %v3338_v20  ;;  %v2878_v20 = vor.u32 %v3796_v13, %v2875_v14  ;;  %v3752_v55 = vld [vmem:[#allocation5 + $0x10c] sm:$0xf]  ;;  %v2955_v62 = vld [vmem:[#allocation5 + $0x318] sm:$0xf0] }
  0xd9   :  { %2005 = vmatpush.bf16.msrb.mxu3 %v3466_v23  ;;  %1964 = vmatmul.bf16.vlgmr.msrb.gmra.mxu0 %v4224_v39  ;;  %v3760_v23 = vld [vmem:[#allocation5 + $0x14c] sm:$0xf]  ;;  %v3195_v0 = vld [vmem:[#allocation5 + $0x4f8] sm:$0xf0]  ;;  %v2702_v8 = vor.u32 %v3752_v55, %v2699_v56 }
  0xda   :  { %2012 = vmatpush.bf16.msra.mxu0 %v2686_v24  ;;  %1978 = vmatmul.bf16.vlgmr.msrb.gmra.mxu1 %v4228_v44  ;;  %v3006_v24 = vor.u32 %v3828_v15, %v3003_v16  ;;  %v3784_v57 = vld [vmem:[#allocation5 + $0x20c] sm:$0xf]  ;;  %v3451_v7 = vld [vmem:[#allocation5 + $0x6f8] sm:$0xf0] }
  0xdb   :  { %2026 = vmatpush.bf16.msra.mxu1 %v2814_v25  ;;  %1992 = vmatmul.bf16.vlgmr.msrb.gmra.mxu2 %v4226_v43  ;;  %v2731_v25 = vld [vmem:[#allocation5 + $0x158] sm:$0xf0]  ;;  %v3816_v61 = vld [vmem:[#allocation5 + $0x30c] sm:$0xf] }
  0xdc   :  { %2040 = vmatpush.bf16.msra.mxu2 %v2942_v26  ;;  %2006 = vmatmul.bf16.vlgmr.msrb.gmra.mxu3 %v4230_v47  ;;  %v3792_v26 = vld [vmem:[#allocation5 + $0x24c] sm:$0xf]  ;;  %v2734_v33 = vor.u32 %v3760_v23, %v2731_v25  ;;  %v3579_v13 = vld [vmem:[#allocation5 + $0x7f8] sm:$0xf0]  ;;  %v2958_v15 = vor.u32 %v3816_v61, %v2955_v62 }
  0xdd   :  { %2054 = vmatpush.bf16.msra.mxu3 %v3070_v30  ;;  %v4256_v30 = vpop.f32.mrf.mxu2  ;;  %v2862_v34 = vor.u32 %v3792_v26, %v2859_v27  ;;  %v3876_v63 = vld [vmem:[#allocation5 + $0x4ec] sm:$0xf]  ;;  %v3179_v22 = vld [vmem:[#allocation5 + $0x4d8] sm:$0xf0] }
  0xde   :  { %2013 = vmatpush.bf16.msra.mxu0 %v2670_v36  ;;  %v2587_v36 = vld [vmem:[#allocation5 + $0x38] sm:$0xf0]  ;;  %v3940_v6 = vld [vmem:[#allocation5 + $0x6ec] sm:$0xf]  ;;  %v3198_v16 = vor.u32 %v3876_v63, %v3195_v0 }
  0xdf   :  { %2027 = vmatpush.bf16.msra.mxu1 %v2798_v37  ;;  %v3756_v37 = vld [vmem:[#allocation5 + $0x12c] sm:$0xf]  ;;  %v2590_v50 = vor.u32 %v3724_v35, %v2587_v36  ;;  %v3307_v25 = vld [vmem:[#allocation5 + $0x5d8] sm:$0xf0] }
  0xe0   :  { %2041 = vmatpush.bf16.msra.mxu2 %v2926_v38  ;;  %v2990_v38 = vor.u32 %v3824_v28, %v2987_v29  ;;  %v3972_v12 = vld [vmem:[#allocation5 + $0x7ec] sm:$0xf]  ;;  %v3435_v27 = vld [vmem:[#allocation5 + $0x6d8] sm:$0xf0] }
  0xe1   :  { %2055 = vmatpush.bf16.msra.mxu3 %v3054_v45  ;;  %v4260_v45 = vpop.f32.mrf.mxu0  ;;  %v3872_v21 = vld [vmem:[#allocation5 + $0x4cc] sm:$0xf]  ;;  %v3147_v56 = vld [vmem:[#allocation5 + $0x498] sm:$0xf0] }
  0xe2   :  { %2014 = vmatpush.bf16.msra.mxu0 %v2654_v52  ;;  %v2571_v52 = vld [vmem:[#allocation5 + $0x18] sm:$0xf0]  ;;  %v3904_v23 = vld [vmem:[#allocation5 + $0x5cc] sm:$0xf] }
  0xe3   :  { %2028 = vmatpush.bf16.msra.mxu1 %v2782_v53  ;;  %v2718_v53 = vor.u32 %v3756_v37, %v2715_v40  ;;  %v3936_v26 = vld [vmem:[#allocation5 + $0x6cc] sm:$0xf]  ;;  %v3310_v35 = vor.u32 %v3904_v23, %v3307_v25  ;;  %v3531_v63 = vld [vmem:[#allocation5 + $0x798] sm:$0xf0] }
  0xe4   :  { %2042 = vmatpush.bf16.msra.mxu2 %v2910_v54  ;;  %v2846_v54 = vor.u32 %v3788_v41, %v2843_v42  ;;  %v3968_v29 = vld [vmem:[#allocation5 + $0x7cc] sm:$0xf]  ;;  %v3438_v36 = vor.u32 %v3936_v26, %v3435_v27  ;;  %v3291_v42 = vld [vmem:[#allocation5 + $0x5b8] sm:$0xf0] }
  0xe5   :  { %2056 = vmatpush.bf16.msra.mxu3 %v3038_v59  ;;  %v2974_v59 = vor.u32 %v3820_v46, %v2971_v48  ;;  %v4264_v14 = vpop.f32.mrf.mxu2  ;;  %v3868_v37 = vld [vmem:[#allocation5 + $0x4ac] sm:$0xf]  ;;  %v3419_v48 = vld [vmem:[#allocation5 + $0x6b8] sm:$0xf0] }
  0xe6   :  { %2015 = vmatpush.bf16.msra.mxu0 %v2638_v2  ;;  %v3908_v2 = vld [vmem:[#allocation5 + $0x5ec] sm:$0xf]  ;;  %v3243_v27 = vld [vmem:[#allocation5 + $0x558] sm:$0xf0] }
  0xe7   :  { %2029 = vmatpush.bf16.msra.mxu1 %v2766_v4  ;;  %v2574_v4 = vor.u32 %v3720_v51, %v2571_v52  ;;  %v3900_v40 = vld [vmem:[#allocation5 + $0x5ac] sm:$0xf]  ;;  %v3547_v51 = vld [vmem:[#allocation5 + $0x7b8] sm:$0xf0] }
  0xe8   :  { %2043 = vmatpush.bf16.msra.mxu2 %v2894_v5  ;;  %v3323_v5 = vld [vmem:[#allocation5 + $0x5f8] sm:$0xf0]  ;;  %v3932_v46 = vld [vmem:[#allocation5 + $0x6ac] sm:$0xf] }
  0xe9   :  { %2057 = vmatpush.bf16.msra.mxu3 %v3022_v11  ;;  %v2830_v11 = vor.u32 %v3784_v57, %v2827_v60  ;;  %v4268_v28 = vpop.f32.mrf.mxu0  ;;  %v3864_v55 = vld [vmem:[#allocation5 + $0x48c] sm:$0xf]  ;;  %v3275_v60 = vld [vmem:[#allocation5 + $0x598] sm:$0xf0] }
  0xea   :  { %2016 = vmatpush.bf16.msra.mxu0 %v2622_v18  ;;  %v4266_v18 = vpop.f32.mrf.mxu3  ;;  %v3928_v61 = vld [vmem:[#allocation5 + $0x68c] sm:$0xf] }
  0xeb   :  { %2030 = vmatpush.bf16.msra.mxu1 %v2750_v19  ;;  %v3326_v19 = vor.u32 %v3908_v2, %v3323_v5  ;;  %v3860_v5 = vld [vmem:[#allocation5 + $0x46c] sm:$0xf] }
  0xec   :  { %2044 = vmatpush.bf16.msra.mxu2 %v2878_v20  ;;  %v3454_v20 = vor.u32 %v3940_v6, %v3451_v7  ;;  %v3131_v6 = vld [vmem:[#allocation5 + $0x478] sm:$0xf0]  ;;  %v3892_v7 = vld [vmem:[#allocation5 + $0x56c] sm:$0xf] }
  0xed   :  { %2058 = vmatpush.bf16.msra.mxu3 %v3006_v24  ;;  %v3582_v24 = vor.u32 %v3972_v12, %v3579_v13  ;;  %v4276_v57 = vpop.f32.mrf.mxu2  ;;  %v3259_v12 = vld [vmem:[#allocation5 + $0x578] sm:$0xf0]  ;;  %v3924_v13 = vld [vmem:[#allocation5 + $0x66c] sm:$0xf] }
  0xee   :  { %2017 = vmatpush.bf16.msra.mxu0 %v2606_v31  ;;  %v3563_v31 = vld [vmem:[#allocation5 + $0x7d8] sm:$0xf0]  ;;  %v3856_v23 = vld [vmem:[#allocation5 + $0x44c] sm:$0xf] }
  0xef   :  { %2031 = vmatpush.bf16.msra.mxu1 %v2734_v33  ;;  %v4270_v33 = vpop.f32.mrf.mxu1  ;;  %v3566_v41 = vor.u32 %v3968_v29, %v3563_v31  ;;  %v3888_v25 = vld [vmem:[#allocation5 + $0x54c] sm:$0xf]  ;;  %v3371_v31 = vld [vmem:[#allocation5 + $0x658] sm:$0xf0] }
  0xf0   :  { %2045 = vmatpush.bf16.msra.mxu2 %v2862_v34  ;;  %v3182_v34 = vor.u32 %v3872_v21, %v3179_v22  ;;  %v3262_v21 = vor.u32 %v3892_v7, %v3259_v12  ;;  %v3920_v29 = vld [vmem:[#allocation5 + $0x64c] sm:$0xf] }
  0xf1   :  { %2059 = vmatpush.bf16.msra.mxu3 %v2990_v38  ;;  %v3163_v38 = vld [vmem:[#allocation5 + $0x4b8] sm:$0xf0]  ;;  %v4280_v0 = vpop.f32.mrf.mxu0  ;;  %v3912_v7 = vld [vmem:[#allocation5 + $0x60c] sm:$0xf] }
  0xf2   :  { %2018 = vmatpush.bf16.msra.mxu0 %v2590_v50  ;;  %v3964_v50 = vld [vmem:[#allocation5 + $0x7ac] sm:$0xf]  ;;  %v3166_v52 = vor.u32 %v3868_v37, %v3163_v38  ;;  %v4278_v62 = vpop.f32.mrf.mxu3 }
  0xf3   :  { %2032 = vmatpush.bf16.msra.mxu1 %v2718_v53  ;;  %v3294_v53 = vor.u32 %v3900_v40, %v3291_v42  ;;  %v3374_v42 = vor.u32 %v3920_v29, %v3371_v31  ;;  %v3944_v12 = vld [vmem:[#allocation5 + $0x70c] sm:$0xf]  ;;  %v3990_v29 = vld [vmem:[#allocation8 + $0x78] sm:$0xff] }
  0xf4   :  { %2046 = vmatpush.bf16.msra.mxu2 %v2846_v54  ;;  %v3422_v54 = vor.u32 %v3932_v46, %v3419_v48  ;;  %v3852_v48 = vld [vmem:[#allocation5 + $0x42c] sm:$0xf] }
  0xf5   :  { %2060 = vmatpush.bf16.msra.mxu3 %v2974_v59  ;;  %v3550_v59 = vor.u32 %v3964_v50, %v3547_v51  ;;  %v4286_v37 = vpop.f32.mrf.mxu2  ;;  %v3099_v50 = vld [vmem:[#allocation5 + $0x438] sm:$0xf0]  ;;  %v3884_v51 = vld [vmem:[#allocation5 + $0x52c] sm:$0xf] }
  0xf6   :  { %2019 = vmatpush.bf16.msra.mxu0 %v2574_v4 }
  0xf7   :  { %2033 = vmatpush.bf16.msra.mxu1 %v2702_v8  ;;  %v4282_v8 = vpop.f32.mrf.mxu1 }
  0xf8   :  { %2047 = vmatpush.bf16.msra.mxu2 %v2830_v11 }
  0xf9   :  { %2061 = vmatpush.bf16.msra.mxu3 %v2958_v15  ;;  %2020 = vmatmul.bf16.vlgmr.msra.gmra.mxu0 %v4212_v58  ;;  %v3403_v58 = vld [vmem:[#allocation5 + $0x698] sm:$0xf0]  ;;  %v1797_v46 = vpop.f32.mrf.mxu0 }
  0xfa   :  { %2068 = vmatpush.bf16.msrb.mxu0 %v3198_v16  ;;  %2034 = vmatmul.bf16.vlgmr.msra.gmra.mxu1 %v4218_v10  ;;  %v3150_v10 = vor.u32 %v3864_v55, %v3147_v56  ;;  %v3406_v4 = vor.u32 %v3928_v61, %v3403_v58  ;;  %v3387_v15 = vld [vmem:[#allocation5 + $0x678] sm:$0xf0]  ;;  %v3956_v16 = vld [vmem:[#allocation5 + $0x76c] sm:$0xf]  ;;  %v4288_v40 = vpop.f32.mrf.mxu3  ;;  %v3102_v58 = vor.u32 %v3852_v48, %v3099_v50 }
  0xfb   :  { %2082 = vmatpush.bf16.msrb.mxu1 %v3326_v19  ;;  %2048 = vmatmul.bf16.vlgmr.msra.gmra.mxu2 %v4214_v1  ;;  %v3896_v1 = vld [vmem:[#allocation5 + $0x58c] sm:$0xf]  ;;  %v3515_v19 = vld [vmem:[#allocation5 + $0x778] sm:$0xf0]  ;;  %v3390_v22 = vor.u32 %v3924_v13, %v3387_v15 }
  0xfc   :  { %2096 = vmatpush.bf16.msrb.mxu2 %v3454_v20  ;;  %2062 = vmatmul.bf16.vlgmr.msra.gmra.mxu3 %v4220_v17  ;;  %v3960_v17 = vld [vmem:[#allocation5 + $0x78c] sm:$0xf]  ;;  %v3278_v2 = vor.u32 %v3896_v1, %v3275_v60  ;;  %v3134_v20 = vor.u32 %v3860_v5, %v3131_v6  ;;  %v3518_v26 = vor.u32 %v3956_v16, %v3515_v19  ;;  %v3355_v55 = vld [vmem:[#allocation5 + $0x638] sm:$0xf0] }
  0xfd   :  { %2110 = vmatpush.bf16.msrb.mxu3 %v3582_v24  ;;  %v3534_v11 = vor.u32 %v3960_v17, %v3531_v63  ;;  %v3115_v24 = vld [vmem:[#allocation5 + $0x458] sm:$0xf0]  ;;  %v3948_v1 = vld [vmem:[#allocation5 + $0x72c] sm:$0xf] }
  0xfe   :  { %2069 = vmatpush.bf16.msrb.mxu0 %v3182_v34  ;;  %v3952_v34 = vld [vmem:[#allocation5 + $0x74c] sm:$0xf]  ;;  %v3118_v38 = vor.u32 %v3856_v23, %v3115_v24  ;;  %v3211_v6 = vld [vmem:[#allocation5 + $0x518] sm:$0xf0] }
  0xff   :  { %2083 = vmatpush.bf16.msrb.mxu1 %v3310_v35  ;;  %v3499_v35 = vld [vmem:[#allocation5 + $0x758] sm:$0xf0]  ;;  %v1811_v56 = vpop.f32.mrf.mxu1 }
 0x100   :  { %2097 = vmatpush.bf16.msrb.mxu2 %v3438_v36  ;;  %v4284_v36 = vld [vmem:[#allocation7] sm:$0xf]  ;;  %v3467_v13 = vld [vmem:[#allocation5 + $0x718] sm:$0xf0] }
 0x101   :  { %2111 = vmatpush.bf16.msrb.mxu3 %v3566_v41  ;;  %v3246_v41 = vor.u32 %v3888_v25, %v3243_v27  ;;  %v348_v60 = vperm.slane %v4284_v36, 0  ;;  %v349_v61 = vperm.slane %v4284_v36, 1  ;;  %v3470_v25 = vor.u32 %v3944_v12, %v3467_v13  ;;  %v1799_v27 = vpop.f32.mrf.mxu0 }
 0x102   :  { %2070 = vmatpush.bf16.msrb.mxu0 %v3166_v52  ;;  %v3502_v52 = vor.u32 %v3952_v34, %v3499_v35  ;;  %v1839_v24 = vpop.f32.mrf.mxu3  ;;  %v3981_v35 = vld [vmem:[#allocation8 + $0x30] sm:$0xff] }
 0x103   :  { %2084 = vmatpush.bf16.msrb.mxu1 %v3294_v53  ;;  %v3227_v53 = vld [vmem:[#allocation5 + $0x538] sm:$0xf0]  ;;  %v1686_v15 = vadd.f32 %v4252_v3, %v348_v60  ;;  %v1688_v16 = vadd.f32 %v4260_v45, %v348_v60 }
 0x104   :  { %2098 = vmatpush.bf16.msrb.mxu2 %v3422_v54  ;;  %v3916_v54 = vld [vmem:[#allocation5 + $0x62c] sm:$0xf]  ;;  %v3230_v17 = vor.u32 %v3884_v51, %v3227_v53 }
 0x105   :  { %2112 = vmatpush.bf16.msrb.mxu3 %v3550_v59  ;;  %v3483_v59 = vld [vmem:[#allocation5 + $0x738] sm:$0xf0]  ;;  %v3358_v63 = vor.u32 %v3916_v54, %v3355_v55  ;;  %v1700_v3 = vadd.f32 %v4254_v9, %v1686_v15  ;;  %v1702_v45 = vadd.f32 %v4262_v49, %v1688_v16  ;;  %v3988_v51 = vld [vmem:[#allocation8 + $0x68] sm:$0xff]  ;;  %v3987_v55 = vld [vmem:[#allocation8 + $0x60] sm:$0xff] }
 0x106   :  { %2071 = vmatpush.bf16.msrb.mxu0 %v3150_v10  ;;  %v3848_v10 = vld [vmem:[#allocation5 + $0x40c] sm:$0xf]  ;;  %v3486_v5 = vor.u32 %v3948_v1, %v3483_v59  ;;  %v3978_v59 = vld [vmem:[#allocation8 + $0x18] sm:$0xff] }
 0x107   :  { %2085 = vmatpush.bf16.msrb.mxu1 %v3278_v2  ;;  %v3083_v2 = vld [vmem:[#allocation5 + $0x418] sm:$0xf0]  ;;  %v1813_v31 = vpop.f32.mrf.mxu1  ;;  %v1716_v9 = vadd.f32 %v4264_v14, %v1702_v45  ;;  %v3984_v15 = vld [vmem:[#allocation8 + $0x48] sm:$0xff] }
 0x108   :  { %2099 = vmatpush.bf16.msrb.mxu2 %v3406_v4  ;;  %v3880_v4 = vld [vmem:[#allocation5 + $0x50c] sm:$0xf]  ;;  %v3086_v19 = vor.u32 %v3848_v10, %v3083_v2  ;;  %v3998_v2 = vld [vmem:[#allocation8 + $0xb8] sm:$0xff] }
 0x109   :  { %2113 = vmatpush.bf16.msrb.mxu3 %v3534_v11  ;;  %v3339_v11 = vld [vmem:[#allocation5 + $0x618] sm:$0xf0] }
 0x10a   :  { %2072 = vmatpush.bf16.msrb.mxu0 %v3134_v20  ;;  %v1825_v20 = vpop.f32.mrf.mxu2  ;;  %v3342_v23 = vor.u32 %v3912_v7, %v3339_v11 }
 0x10b   :  { %2086 = vmatpush.bf16.msrb.mxu1 %v3262_v21  ;;  %v1798_v21 = vadd.f32 %v1797_v46, %v349_v61  ;;  %v3980_v46 = vld [vmem:[#allocation8 + $0x28] sm:$0xff] }
 0x10c   :  { %2100 = vmatpush.bf16.msrb.mxu2 %v3390_v22  ;;  %v3214_v22 = vor.u32 %v3880_v4, %v3211_v6  ;;  %v3977_v4 = vld [vmem:[#allocation8 + $0x10] sm:$0xff] }
 0x10d   :  { %2114 = vmatpush.bf16.msrb.mxu3 %v3518_v26  ;;  %v3982_v26 = vld [vmem:[#allocation8 + $0x38] sm:$0xff]  ;;  %v1812_v34 = vadd.f32 %v1811_v56, %v1798_v21  ;;  %v3997_v6 = vld [vmem:[#allocation8 + $0xb0] sm:$0xff] }
 0x10e   :  { %2073 = vmatpush.bf16.msrb.mxu0 %v3118_v38  ;;  %v1800_v38 = vadd.f32 %v1799_v27, %v349_v61 }
 0x10f   :  { %2087 = vmatpush.bf16.msrb.mxu1 %v3246_v41  ;;  %v3989_v41 = vld [vmem:[#allocation8 + $0x70] sm:$0xff]  ;;  %v1826_v49 = vadd.f32 %v1825_v20, %v1812_v34 }
 0x110   :  { %2101 = vmatpush.bf16.msrb.mxu2 %v3374_v42  ;;  %v1714_v42 = vadd.f32 %v4256_v30, %v1700_v3  ;;  %v1814_v50 = vadd.f32 %v1813_v31, %v1800_v38  ;;  %v3979_v30 = vld [vmem:[#allocation8 + $0x20] sm:$0xff]  ;;  %v3996_v31 = vld [vmem:[#allocation8 + $0xa8] sm:$0xff]  ;;  %v3994_v3 = vld [vmem:[#allocation8 + $0x98] sm:$0xff]  ;;  %v350_v38 = vperm.slane %v4284_v36, 2 }
 0x111   :  { %2115 = vmatpush.bf16.msrb.mxu3 %v3502_v52  ;;  %v1840_v53 = vadd.f32 %v1839_v24, %v1826_v49  ;;  %v3993_v34 = vld [vmem:[#allocation8 + $0x90] sm:$0xff] }
 0x112   :  { %2074 = vmatpush.bf16.msrb.mxu0 %v3102_v58  ;;  %v1827_v48 = vpop.f32.mrf.mxu2  ;;  %v1728_v52 = vadd.f32 %v4258_v32, %v1714_v42  ;;  %v3986_v32 = vld [vmem:[#allocation8 + $0x58] sm:$0xff] }
 0x113   :  { %2088 = vmatpush.bf16.msrb.mxu1 %v3230_v17  ;;  %v1828_v14 = vadd.f32 %v1827_v48, %v1814_v50 }
 0x114   :  { %2102 = vmatpush.bf16.msrb.mxu2 %v3358_v63 }
 0x115   :  { %2116 = vmatpush.bf16.msrb.mxu3 %v3486_v5  ;;  %v3985_v5 = vld [vmem:[#allocation8 + $0x50] sm:$0xff] }
 0x116   :  { %2075 = vmatpush.bf16.msrb.mxu0 %v3086_v19 }
 0x117   :  { %2089 = vmatpush.bf16.msrb.mxu1 %v3214_v22  ;;  %v1867_v54 = vpop.f32.mrf.mxu1  ;;  %v3975_v22 = vld [vmem:[#allocation8] sm:$0xff] }
 0x118   :  { %2103 = vmatpush.bf16.msrb.mxu2 %v3342_v23 }
 0x119   :  { %2117 = vmatpush.bf16.msrb.mxu3 %v3470_v25  ;;  %2076 = vmatmul.bf16.vlgmr.msrb.gmra.mxu0 %v4224_v39  ;;  %v1841_v39 = vpop.f32.mrf.mxu3 }
 0x11a   :  { %2396 = vmatpush.bf16.msra.mxu0 %v3982_v26  ;;  %2090 = vmatmul.bf16.vlgmr.msrb.gmra.mxu1 %v4228_v44  ;;  %v1730_v44 = vadd.f32 %v4266_v18, %v1716_v9  ;;  %v1842_v60 = vadd.f32 %v1841_v39, %v1828_v14 }
 0x11b   :  { %2410 = vmatpush.bf16.msra.mxu1 %v3990_v29  ;;  %2104 = vmatmul.bf16.vlgmr.msrb.gmra.mxu2 %v4226_v43  ;;  %v1853_v43 = vpop.f32.mrf.mxu0 }
 0x11c   :  { %2118 = vmatmul.bf16.vlgmr.msrb.gmra.mxu3 %v4230_v47  ;;  %v1742_v47 = vadd.f32 %v4268_v28, %v1728_v52  ;;  %v1744_v56 = vadd.f32 %v4280_v0, %v1730_v44  ;;  %v1854_v1 = vadd.f32 %v1853_v43, %v1840_v53  ;;  %2424 = vmatpush.bf16.msra.mxu2 %v3998_v2 }
 0x11e   :  { %2397 = vmatpush.bf16.msra.mxu0 %v3981_v35  ;;  %v1881_v61 = vpop.f32.mrf.mxu2  ;;  %v1756_v18 = vadd.f32 %v4270_v33, %v1742_v47  ;;  %v1758_v58 = vadd.f32 %v4282_v8, %v1744_v56  ;;  %v1868_v17 = vadd.f32 %v1867_v54, %v1854_v1  ;;  %v3976_v33 = vld [vmem:[#allocation8 + $0x8] sm:$0xff] }
 0x11f   :  { %2411 = vmatpush.bf16.msra.mxu1 %v3989_v41  ;;  %v1869_v7 = vpop.f32.mrf.mxu1  ;;  %v3992_v41 = vld [vmem:[#allocation8 + $0x88] sm:$0xff] }
 0x120   :  { %v1772_v28 = vadd.f32 %v4286_v37, %v1758_v58  ;;  %v1770_v11 = vadd.f32 %v4276_v57, %v1756_v18  ;;  %v1882_v12 = vadd.f32 %v1881_v61, %v1868_v17  ;;  %2425 = vmatpush.bf16.msra.mxu2 %v3997_v6  ;;  %v3983_v57 = vld [vmem:[#allocation8 + $0x40] sm:$0xff] }
 0x121   :  { %v1895_v10 = vpop.f32.mrf.mxu3 }
 0x122   :  { %2398 = vmatpush.bf16.msra.mxu0 %v3980_v46  ;;  %v1786_v8 = vadd.f32 %v4288_v40, %v1772_v28  ;;  %v1784_v37 = vadd.f32 %v4278_v62, %v1770_v11  ;;  %v1896_v19 = vadd.f32 %v1895_v10, %v1882_v12  ;;  %v3995_v62 = vld [vmem:[#allocation8 + $0xa0] sm:$0xff]  ;;  %v4006_v10 = vld [vmem:[#allocation8 + $0xf8] sm:$0xff]  ;;  %v4004_v12 = vld [vmem:[#allocation8 + $0xe8] sm:$0xff] }
 0x123   :  { %2412 = vmatpush.bf16.msra.mxu1 %v3988_v51  ;;  %v1855_v63 = vpop.f32.mrf.mxu0  ;;  %v3991_v46 = vld [vmem:[#allocation8 + $0x80] sm:$0xff]  ;;  %2438 = vmatpush.bf16.msra.mxu3 %v4006_v10 }
 0x124   :  { %v1856_v0 = vadd.f32 %v1855_v63, %v1842_v60  ;;  %v2128_v23 = vmax.f32 %v1786_v8, 0.0  ;;  %v2124_v25 = vmax.f32 %v1784_v37, 0.0  ;;  %v2125_v26 = vmax.f32 %v1896_v19, 0.0  ;;  %2426 = vmatpush.bf16.msra.mxu2 %v3996_v31  ;;  %v4002_v8 = vld [vmem:[#allocation8 + $0xd8] sm:$0xff] }
 0x125   :  { %v351_v19 = vperm.slane %v4284_v36, 3 }
 0x126   :  { %2399 = vmatpush.bf16.msra.mxu0 %v3979_v30  ;;  %v1870_v13 = vadd.f32 %v1869_v7, %v1856_v0  ;;  %v1883_v16 = vpop.f32.mrf.mxu2  ;;  %v2132_v40 = vpack.c.bf16 %v2128_v23, %v2124_v25  ;;  %v4005_v0 = vld [vmem:[#allocation8 + $0xf0] sm:$0xff] }
 0x127   :  { %2413 = vmatpush.bf16.msra.mxu1 %v3987_v55  ;;  %2439 = vmatpush.bf16.msra.mxu3 %v4005_v0 }
 0x128   :  { %v1884_v20 = vadd.f32 %v1883_v16, %v1870_v13  ;;  %2427 = vmatpush.bf16.msra.mxu2 %v3995_v62  ;;  %v4001_v13 = vld [vmem:[#allocation8 + $0xd0] sm:$0xff]  ;;  %v4000_v16 = vld [vmem:[#allocation8 + $0xc8] sm:$0xff] }
 0x129   :  { %v1897_v21 = vpop.f32.mrf.mxu3 }
 0x12a   :  { %2400 = vmatpush.bf16.msra.mxu0 %v3978_v59  ;;  %v1898_v24 = vadd.f32 %v1897_v21, %v1884_v20  ;;  %v3999_v20 = vld [vmem:[#allocation8 + $0xc0] sm:$0xff] }
 0x12b   :  { %2414 = vmatpush.bf16.msra.mxu1 %v3986_v32  ;;  %2440 = vmatpush.bf16.msra.mxu3 %v4004_v12 }
 0x12c   :  { %v2129_v27 = vmax.f32 %v1898_v24, 0.0  ;;  %2428 = vmatpush.bf16.msra.mxu2 %v3994_v3 }
 0x12e   :  { %2401 = vmatpush.bf16.msra.mxu0 %v3977_v4  ;;  %v2133_v29 = vpack.c.bf16 %v2129_v27, %v2125_v26 }
 0x12f   :  { %2415 = vmatpush.bf16.msra.mxu1 %v3985_v5 }
 0x130   :  { %2429 = vmatpush.bf16.msra.mxu2 %v3993_v34 }
 0x132   :  { %2402 = vmatpush.bf16.msra.mxu0 %v3976_v33  ;;  %v4003_v33 = vld [vmem:[#allocation8 + $0xe0] sm:$0xff] }
 0x133   :  { %2416 = vmatpush.bf16.msra.mxu1 %v3984_v15  ;;  %2441 = vmatpush.bf16.msra.mxu3 %v4003_v33 }
 0x134   :  { %2430 = vmatpush.bf16.msra.mxu2 %v3992_v41 }
 0x136   :  { %2403 = vmatpush.bf16.msra.mxu0 %v3975_v22  ;;  %v1909_v45 = vpop.f32.mrf.mxu0 }
 0x137   :  { %2417 = vmatpush.bf16.msra.mxu1 %v3983_v57  ;;  %v1923_v35 = vpop.f32.mrf.mxu1  ;;  %v1910_v9 = vadd.f32 %v1909_v45, %v350_v38  ;;  %2442 = vmatpush.bf16.msra.mxu3 %v4002_v8 }
 0x138   :  { %2431 = vmatpush.bf16.msra.mxu2 %v3991_v46 }
 0x139   :  { %2404 = vmatmul.bf16.vlgmr.msra.gmra.mxu0 %v2132_v40  ;;  %v1924_v39 = vadd.f32 %v1923_v35, %v1910_v9 }
 0x13a   :  { %2418 = vmatmul.bf16.vlgmr.msra.gmra.mxu1 %v2133_v29 }
 0x13b   :  { %2443 = vmatpush.bf16.msra.mxu3 %v4001_v13 }
 0x13e   :  { %v1937_v42 = vpop.f32.mrf.mxu2  ;;  %v1911_v48 = vpop.f32.mrf.mxu0 }
 0x13f   :  { %v1951_v49 = vpop.f32.mrf.mxu3  ;;  %v1925_v50 = vpop.f32.mrf.mxu1  ;;  %v1912_v51 = vadd.f32 %v1911_v48, %v350_v38  ;;  %v1938_v52 = vadd.f32 %v1937_v42, %v1924_v39  ;;  %2444 = vmatpush.bf16.msra.mxu3 %v4000_v16 }
 0x141   :  { %v1926_v53 = vadd.f32 %v1925_v50, %v1912_v51  ;;  %v1952_v30 = vadd.f32 %v1951_v49, %v1938_v52 }
 0x143   :  { %2445 = vmatpush.bf16.msra.mxu3 %v3999_v20 }
 0x146   :  { %v1939_v44 = vpop.f32.mrf.mxu2 }
 0x147   :  { %v1953_v43 = vpop.f32.mrf.mxu3  ;;  %v1940_v55 = vadd.f32 %v1939_v44, %v1926_v53 }
 0x149   :  { %v1954_v56 = vadd.f32 %v1953_v43, %v1940_v55  ;;  %v4020_v55 = vld [vmem:[%s4332_s4] ss:$0 sm:$0xff]  ;;  %s4167_s4 = smov [#allocation10]  }
 0x14a   :  { %s2510_s17 = sshll.u32 %s4167_s4, 4  ;;  %s2511_s17 = int_to_ptr.vmem [resolvable:$true] %s2510_s17 }
 0x156   :  { %v1965_v54 = vpop.f32.mrf.mxu0 }
 0x157   :  { %v1979_v14 = vpop.f32.mrf.mxu1  ;;  %v1966_v47 = vadd.f32 %v1965_v54, %v1952_v30 }
 0x159   :  { %v1980_v59 = vadd.f32 %v1979_v14, %v1966_v47 }
 0x15e   :  { %v1993_v1 = vpop.f32.mrf.mxu2  ;;  %v1967_v60 = vpop.f32.mrf.mxu0 }
 0x15f   :  { %v2007_v32 = vpop.f32.mrf.mxu3  ;;  %v1968_v61 = vadd.f32 %v1967_v60, %v1954_v56  ;;  %v1981_v18 = vpop.f32.mrf.mxu1  ;;  %v1994_v58 = vadd.f32 %v1993_v1, %v1980_v59  ;;  %v2452_v56 = vlaneseq }
 0x161   :  { %v1982_v17 = vadd.f32 %v1981_v18, %v1968_v61  ;;  %v2008_v2 = vadd.f32 %v2007_v32, %v1994_v58  ;;  %v4317_v60 = vand.u32 127, %v2452_v56 }
 0x163   :  { %v2126_v6 = vmax.f32 %v2008_v2, 0.0  ;;  %vm2454_vm0 = vcmp.lt.s32.totalorder %v4317_v60, 8  ;;  %vm2501_vm5 = vcmp.eq.s32.totalorder %v4317_v60, 8 }
 0x166   :  { %v1995_v63 = vpop.f32.mrf.mxu2 }
 0x167   :  { %v1996_v4 = vadd.f32 %v1995_v63, %v1982_v17  ;;  %v2009_v28 = vpop.f32.mrf.mxu3 }
 0x169   :  { %v2010_v5 = vadd.f32 %v2009_v28, %v1996_v4 }
 0x16b   :  { %v2130_v7 = vmax.f32 %v2010_v5, 0.0 }
 0x16d   :  { %v2134_v11 = vpack.c.bf16 %v2130_v7, %v2126_v6 }
 0x16f   :  { %2432 = vmatmul.bf16.vlgmr.msra.gmra.mxu2 %v2134_v11 }
 0x176   :  { %v2021_v15 = vpop.f32.mrf.mxu0 }
 0x177   :  { %v2035_v37 = vpop.f32.mrf.mxu1  ;;  %v2022_v23 = vadd.f32 %v2021_v15, %v351_v19 }
 0x179   :  { %v2036_v25 = vadd.f32 %v2035_v37, %v2022_v23 }
 0x17e   :  { %v2049_v21 = vpop.f32.mrf.mxu2  ;;  %v2023_v24 = vpop.f32.mrf.mxu0 }
 0x17f   :  { %v2063_v22 = vpop.f32.mrf.mxu3  ;;  %v2037_v57 = vpop.f32.mrf.mxu1  ;;  %v2024_v26 = vadd.f32 %v2023_v24, %v351_v19  ;;  %v2050_v40 = vadd.f32 %v2049_v21, %v2036_v25 }
 0x181   :  { %v2038_v29 = vadd.f32 %v2037_v57, %v2024_v26  ;;  %v2064_v45 = vadd.f32 %v2063_v22, %v2050_v40 }
 0x186   :  { %v2051_v27 = vpop.f32.mrf.mxu2 }
 0x187   :  { %v2065_v31 = vpop.f32.mrf.mxu3  ;;  %v2052_v34 = vadd.f32 %v2051_v27, %v2038_v29 }
 0x189   :  { %v2066_v36 = vadd.f32 %v2065_v31, %v2052_v34 }
 0x196   :  { %v2077_v62 = vpop.f32.mrf.mxu0 }
 0x197   :  { %v2091_v3 = vpop.f32.mrf.mxu1  ;;  %v2078_v35 = vadd.f32 %v2077_v62, %v2064_v45 }
 0x199   :  { %v2092_v9 = vadd.f32 %v2091_v3, %v2078_v35 }
 0x19e   :  { %v2105_v38 = vpop.f32.mrf.mxu2  ;;  %v2079_v42 = vpop.f32.mrf.mxu0 }
 0x19f   :  { %v2119_v41 = vpop.f32.mrf.mxu3  ;;  %v2080_v49 = vadd.f32 %v2079_v42, %v2066_v36  ;;  %v2106_v46 = vadd.f32 %v2105_v38, %v2092_v9  ;;  %v2093_v48 = vpop.f32.mrf.mxu1 }
 0x1a1   :  { %v2094_v50 = vadd.f32 %v2093_v48, %v2080_v49  ;;  %v2120_v51 = vadd.f32 %v2119_v41, %v2106_v46 }
 0x1a3   :  { %v2127_v43 = vmax.f32 %v2120_v51, 0.0 }
 0x1a6   :  { %v2107_v39 = vpop.f32.mrf.mxu2 }
 0x1a7   :  { %v2108_v52 = vadd.f32 %v2107_v39, %v2094_v50  ;;  %v2121_v44 = vpop.f32.mrf.mxu3 }
 0x1a9   :  { %v2122_v53 = vadd.f32 %v2121_v44, %v2108_v52 }
 0x1ab   :  { %v2131_v30 = vmax.f32 %v2122_v53, 0.0 }
 0x1ad   :  { %v2135_v54 = vpack.c.bf16 %v2131_v30, %v2127_v43 }
 0x1af   :  { %2446 = vmatmul.bf16.vlgmr.msra.gmra.mxu3 %v2135_v54 }
 0x1b6   :  { %v2405_v14 = vpop.f32.mrf.mxu0 }
 0x1b7   :  { %v2419_v47 = vpop.f32.mrf.mxu1  ;;  %v2406_v1 = vadd.f32 %v4020_v55, %v2405_v14 }
 0x1b9   :  { %v2420_v32 = vadd.f32 %v2419_v47, %v2406_v1 }
 0x1be   :  { %v2407_v61 = vpop.f32.mrf.mxu0 }
 0x1bf   :  { %v2408_v17 = vadd.f32 %v4020_v55, %v2407_v61  ;;  %v2421_v10 = vpop.f32.mrf.mxu1 }
 0x1c1   :  { %v2422_v28 = vadd.f32 %v2421_v10, %v2408_v17 }
 0x1f2   :  { %v2433_v59 = vpop.f32.mrf.mxu2 }
 0x1f3   :  { %v2434_v18 = vadd.f32 %v2433_v59, %v2420_v32 }
 0x1fa   :  { %v2435_v4 = vpop.f32.mrf.mxu2 }
 0x1fb   :  { %v2436_v0 = vadd.f32 %v2435_v4, %v2422_v28 }
 0x232   :  { %v2447_v58 = vpop.f32.mrf.mxu3 }
 0x233   :  { %v2448_v63 = vadd.f32 %v2447_v58, %v2434_v18 }
 0x235   :  { %v2455_v2 = vsel %vm2454_vm0, %v2448_v63, -1e+30 }
 0x236   :  { %2457 = vmax.xlane.f32.xlu0 %v2455_v2 }
 0x23a   :  { %v2449_v5 = vpop.f32.mrf.mxu3 }
 0x23b   :  { %v2450_v6 = vadd.f32 %v2449_v5, %v2436_v0 }
 0x23d   :  { %v2456_v7 = vsel %vm2454_vm0, %v2450_v6, -1e+30 }
 0x23e   :  { %2459 = vmax.xlane.f32.xlu0 %v2456_v7 }
 0x2a9   :  { %v2458_v11 = vpop.xlane.xlu0 %2457 }
 0x2aa   :  { %v2461_v12 = vsub.f32 %v2455_v2, %v2458_v11 }
 0x2ac   :  { %v2463_v33 = vmul.f32 1.442695, %v2461_v12 }
 0x2ae   :  { %4021 = vpow2.f32 %v2463_v33 }
 0x2b1   :  { %v2460_v8 = vpop.xlane.xlu0 %2459 }
 0x2b2   :  { %v2462_v13 = vsub.f32 %v2456_v7, %v2460_v8 }
 0x2b4   :  { %v4022_v15 = vpop.eup %4021  ;;  %v2465_v16 = vmul.f32 1.442695, %v2462_v13 }
 0x2b5   :  { %2467 = vadd.xlane.f32.xlu1 %v4022_v15 }
 0x2b6   :  { %4023 = vpow2.f32 %v2465_v16 }
 0x2bc   :  { %v4024_v37 = vpop.eup %4023 }
 0x2bd   :  { %2469 = vadd.xlane.f32.xlu1 %v4024_v37 }
 0x328   :  { %v2468_v19 = vpop.xlane.xlu1 %2467 }
 0x329   :  { %4025 = vrcp.f32 %v2468_v19  ;;  %v2482_v24 = vand.u32 2147483648, %v2468_v19  ;;  %v2480_v25 = vand.u32 2147483647, %v2468_v19  ;;  %vm2476_vm2 = vweird.f32 %v2468_v19 }
 0x32b   :  { %v2483_v40 = vor.u32 1.1754944e-38, %v2482_v24  ;;  %vm2481_vm4 = vcmp.eq.f32.partialorder %v2480_v25, 8.507059e+37 }
 0x32f   :  { %v4026_v20 = vpop.eup %4025 }
 0x330   :  { %v2472_v21 = vmul.f32 %v4026_v20, %v2468_v19  ;;  %v2470_v22 = vpop.xlane.xlu1 %2469  ;;  %vm2477_vm1 = vweird.f32 %v4026_v20 }
 0x331   :  { %4027 = vrcp.f32 %v2470_v22  ;;  %vm2478_vm3 = vmor %vm2476_vm2, %vm2477_vm1  ;;  %v2497_v34 = vand.u32 2147483648, %v2470_v22  ;;  %v2495_v38 = vand.u32 2147483647, %v2470_v22  ;;  %vm2491_vm7 = vweird.f32 %v2470_v22 }
 0x332   :  { %v2473_v23 = vsub.f32 1.0, %v2472_v21 }
 0x333   :  { %v2498_v42 = vor.u32 1.1754944e-38, %v2497_v34  ;;  %vm2496_vm9 = vcmp.eq.f32.partialorder %v2495_v38, 8.507059e+37 }
 0x334   :  { %v2474_v57 = vmul.f32 %v4026_v20, %v2473_v23 }
 0x336   :  { %v2475_v26 = vadd.f32 %v4026_v20, %v2474_v57 }
 0x337   :  { %v4028_v27 = vpop.eup %4027 }
 0x338   :  { %v2479_v29 = vsel %vm2478_vm3, %v4026_v20, %v2475_v26  ;;  %v2487_v31 = vmul.f32 %v4028_v27, %v2470_v22  ;;  %vm2492_vm6 = vweird.f32 %v4028_v27 }
 0x339   :  { %v2484_v62 = vsel %vm2481_vm4, %v2483_v40, %v2479_v29  ;;  %vm2493_vm8 = vmor %vm2491_vm7, %vm2492_vm6 }
 0x33a   :  { %v2485_v3 = vmul.f32 %v4022_v15, %v2484_v62  ;;  %v2488_v45 = vsub.f32 1.0, %v2487_v31 }
 0x33c   :  { %v2489_v35 = vmul.f32 %v4028_v27, %v2488_v45  ;;  %v2502_v36 = vsel %vm2501_vm5, %v2448_v63, %v2485_v3 }
 0x33d   :  { %2504 = vst [vmem:[#allocation10] sm:$0xff] %v2502_v36 }
 0x33e   :  { %v2490_v41 = vadd.f32 %v4028_v27, %v2489_v35 }
 0x340   :  { %v2494_v9 = vsel %vm2493_vm8, %v4028_v27, %v2490_v41 }
 0x341   :  { %v2499_v49 = vsel %vm2496_vm9, %v2498_v42, %v2494_v9 }
 0x342   :  { %v2500_v46 = vmul.f32 %v4024_v37, %v2499_v49 }
 0x344   :  { %v2503_v48 = vsel %vm2501_vm5, %v2450_v6, %v2500_v46 }
 0x345   :  { %2505 = vst [vmem:[#allocation10 + $0x8] sm:$0xff] %v2503_v48 }
 0x346   :  { %2518 = dma.vmem_to_hbm [thread:$0]  %s2511_s17, 256, %s2513_s20, [#allocation4], %s4168_s21, %s4168_s21, %s4169_s22  }
 0x347   :  { %4155 = dma.done.wait [#allocation4], 256  }
 0x348   :  { %4156 = vsyncadd [#allocation4], 4294967040 }
 0x349   :  { %2523 = vsyncpa [#allocation3], 1 }
 0x34a   :  { %2524 = vsyncpa [#allocation6], 1 }
 0x34b   :  { %2525 = vsyncpa [#allocation9], 1 }
 0x34c   :  { %2526 = vsyncpa [#allocation4], 1 }

</bundles_post_ra>
